<compile_context>
chip_gen: v5e
topology: v5e:2x2
jax: 0.10.0
libtpu: 0.0.40
codegen_flags: <defaults>
</compile_context>

<pallas_src>
import functools
import math

import jax
import jax.numpy as jnp
from jax.experimental import pallas as pl
from jax.experimental.pallas import tpu as pltpu

_MIB = 1024 * 1024


def _round_up(v, m):
    return ((v + m - 1) // m) * m


def _squeeze_and_merge(shape, perm):
    """Drop size-1 dims, then merge runs of dims that are adjacent and
    in-order in both the input and the output view."""
    keep = [d for d in range(len(shape)) if shape[d] != 1]
    if len(keep) <= 1:
        return tuple(shape[d] for d in keep), tuple(range(len(keep)))
    pos = {d: i for i, d in enumerate(keep)}
    sq_shape = [shape[d] for d in keep]
    sq_perm = [pos[p] for p in perm if p in pos]

    groups = [[sq_perm[0]]]
    for p in sq_perm[1:]:
        if p == groups[-1][-1] + 1:
            groups[-1].append(p)
        else:
            groups.append([p])
    groups_in = sorted(groups, key=lambda g: g[0])        # input order
    merged_shape = tuple(
        functools.reduce(lambda a, b: a * b, (sq_shape[d] for d in g), 1)
        for g in groups_in)
    gid = {id(g): i for i, g in enumerate(groups_in)}
    merged_perm = tuple(gid[id(g)] for g in groups)       # output order
    return merged_shape, merged_perm


@functools.lru_cache(maxsize=None)
def _fused_store_supported(dtype_name, lane_extent):
    """Probe whether Mosaic can lower `transpose + collapse-minor-dims reshape`
    for this dtype / narrow output-lane extent.  Runs a tiny kernel once
    (cached, forced eager); on failure callers use the masked-store path."""
    try:
        with jax.ensure_compile_time_eval():
            dtype = jnp.dtype(dtype_name)
            n = 8 * lane_extent * 128
            x = (jnp.arange(n, dtype=jnp.float32) % 251.0).astype(dtype)
            x = x.reshape(8, lane_extent, 128)

            def kernel(x_ref, o_ref):
                o_ref[...] = jnp.transpose(
                    x_ref[...], (0, 2, 1)).reshape(o_ref.shape)

            out = pl.pallas_call(
                kernel,
                out_shape=jax.ShapeDtypeStruct((8, 128 * lane_extent), dtype),
            )(x)
            ref = jnp.transpose(x, (0, 2, 1)).reshape(8, 128 * lane_extent)
            return bool(jax.block_until_ready(jnp.array_equal(out, ref)))
    except Exception:
        return False


def _plan_blocks(shape, perm, itemsize, target_bytes, out_fuse):
    """Choose per-(merged-)input-dim block sizes.

    Returns (block, padded_cost_bytes).  Padded cost counts both the input-
    and output-layout VMEM tiles with the minor dim rounded up to 128 lanes
    and the second-minor dim rounded up to the sublane multiple.
    """
    m = len(shape)
    sub_mult = max(8, 32 // itemsize)          # 8 f32 / 16 bf16 / 32 int8
    in_lane, in_sub = m - 1, m - 2
    out_lane, out_sub = perm[-1], perm[-2]

    lane_dims = {in_lane, out_lane}
    sub_dims = {in_sub, out_sub} - lane_dims
    batch_dims = [d for d in range(m)
                  if d not in lane_dims and d not in sub_dims]

    # "block must be a multiple of req[d] OR the full extent" — the (8,128)
    # BlockSpec rule applied to every VMEM view this dim appears in.
    req = [1] * m

    def add_req(d, r):
        req[d] = req[d] * r // math.gcd(req[d], r)

    add_req(in_lane, 128)
    add_req(in_sub, sub_mult)
    if out_fuse:
        add_req(out_sub, 128 // math.gcd(shape[out_lane], 128))
        if m >= 3:
            add_req(perm[-3], 8)               # second-minor of the fused view
    else:
        add_req(out_lane, 128)
        add_req(out_sub, sub_mult)

    block = [0] * m
    for d in range(m):
        if d in lane_dims or d in sub_dims:
            block[d] = shape[d]
        else:
            block[d] = min(shape[d], req[d])

    def padded_cost(blk):
        def view_bytes(dims):
            dims = list(dims)
            dims[-1] = _round_up(dims[-1], 128)
            if len(dims) >= 2:
                dims[-2] = _round_up(dims[-2], sub_mult)
            n = itemsize
            for v in dims:
                n *= v
            return n

        in_dims = [blk[d] for d in range(m)]
        out_dims = [blk[d] for d in perm]
        if out_fuse:
            out_dims = out_dims[:-2] + [out_dims[-2] * out_dims[-1]]
        return view_bytes(in_dims) + view_bytes(out_dims)

    def fits(d, v):
        old = block[d]
        block[d] = v
        ok = padded_cost(block) <= target_bytes
        block[d] = old
        return ok

    def shrink(d, unit):
        if shape[d] <= unit:
            return
        while block[d] > unit and padded_cost(block) > target_bytes:
            nv = max(unit, ((block[d] // 2) // unit) * unit)
            if nv >= block[d]:
                break
            block[d] = nv

    def grow(d, unit):
        if fits(d, shape[d]):
            block[d] = shape[d]
            return
        v = block[d]
        while True:
            nv = min(shape[d] - 1, max(v * 2, unit))
            nv = (nv // unit) * unit
            if nv <= v or not fits(d, nv):
                break
            v = nv
        block[d] = max(block[d], v)

    # 1) Shrink sublane-role dims (largest extent first) until within budget.
    for d in sorted(sub_dims, key=lambda dd: -shape[dd]):
        if padded_cost(block) <= target_bytes:
            break
        shrink(d, max(req[d], sub_mult))

    # 2) Last resort for very large lane extents: tile them in 128 multiples.
    for d in sorted(lane_dims, key=lambda dd: -shape[dd]):
        if padded_cost(block) <= target_bytes:
            break
        if out_fuse and d == out_lane:
            continue                            # fused lane dim must stay full
        shrink(d, 128)

    # 3) Fold batch dims into the tile (largest first) to amortize the
    #    per-grid-step overhead; whatever is left becomes the grid.
    for d in sorted(batch_dims, key=lambda dd: -shape[dd]):
        if padded_cost(block) >= target_bytes:
            break
        grow(d, max(req[d], 1))

    return block, padded_cost(block)


def _permute_kernel(perm):
    def kernel(x_ref, o_ref):
        # When the output's last two dims are fused, the reshape collapses the
        # (tile, out_lane) minor pair into one lane-dense dim; otherwise the
        # shapes already match and the reshape is a no-op.
        o_ref[...] = jnp.transpose(x_ref[...], perm).reshape(o_ref.shape)
    return kernel


def pallas_permute(x, perm, *, force_pallas=False,
                   min_pallas_bytes=512 * 1024, target_block_bytes=None):
    """Permute axes of `x` with a tiled Pallas TPU kernel (== torch.permute)."""
    perm = tuple(int(p) for p in perm)
    ndim = x.ndim
    assert len(perm) == ndim and sorted(perm) == list(range(ndim)), perm

    if perm == tuple(range(ndim)):
        return x
    out_shape_full = tuple(x.shape[p] for p in perm)
    itemsize = jnp.dtype(x.dtype).itemsize

    # Tiny tensors: XLA's native copy beats per-grid-step kernel overhead.
    if not force_pallas and x.size * itemsize < min_pallas_bytes:
        return jnp.transpose(x, perm)

    # Canonicalize: drop size-1 dims, merge dims adjacent & in-order in both
    # views (NCHW->NHWC becomes (N,C,HW)->(N,HW,C)): lane-dense I/O, lower rank.
    m_shape, m_perm = _squeeze_and_merge(tuple(x.shape), perm)
    m = len(m_shape)
    if m < 2 or m_perm == tuple(range(m)):
        # Only size-1 axes move: pure relabeling, no data movement needed.
        return jnp.reshape(x, out_shape_full)

    # Generation-aware tile / VMEM budgets (padded-byte accounting).
    kind = ""
    try:
        kind = jax.devices()[0].device_kind.lower()
    except Exception:
        pass
    if ("v5" in kind) or ("v6" in kind):       # 128 MiB physical VMEM
        default_target, vmem_cap = 12 * _MIB, 96 * _MIB
    else:                                      # v7x (64 MiB) / unknown: conservative
        default_target, vmem_cap = 4 * _MIB, 40 * _MIB
    target = int(target_block_bytes or default_target)

    out_lane = m_perm[-1]
    out_fuse = (m >= 3 and m_shape[out_lane] < 128 and
                _fused_store_supported(str(jnp.dtype(x.dtype)),
                                       m_shape[out_lane]))

    block, padded_cost = _plan_blocks(m_shape, m_perm, itemsize, target,
                                      out_fuse)

    # Grid over every merged dim whose block is smaller than its extent,
    # largest-step axes first (well-shaped leading "parallel" axis for v7x
    # megacore; ordering is irrelevant on single-TC v5e/v6e).
    grid_dims = sorted((d for d in range(m) if block[d] < m_shape[d]),
                       key=lambda d: -pl.cdiv(m_shape[d], block[d]))
    if grid_dims:
        grid = tuple(pl.cdiv(m_shape[d], block[d]) for d in grid_dims)
        dim_sem = ("parallel",) * len(grid)    # all output blocks are disjoint
    else:
        grid = (1,)
        dim_sem = ("arbitrary",)
    grid_pos = {d: i for i, d in enumerate(grid_dims)}

    def make_index_map(dims):
        def index_map(*g):
            return tuple(g[grid_pos[d]] if d in grid_pos else 0 for d in dims)
        return index_map

    total_steps = 1
    for s in grid:
        total_steps *= s
    in_kwargs = {}
    if total_steps > 8 and padded_cost < _MIB:
        # Many small tiles: deepen input pipelining to hide exposed DMA latency.
        in_kwargs["pipeline_mode"] = pl.Buffered(3)
    in_spec = pl.BlockSpec(tuple(block), make_index_map(tuple(range(m))),
                           **in_kwargs)

    if out_fuse:
        lead = m_perm[:-2]
        fused_sub = m_perm[-2]
        pallas_out_shape = tuple(m_shape[d] for d in lead) + (
            m_shape[fused_sub] * m_shape[out_lane],)
        out_block = tuple(block[d] for d in lead) + (
            block[fused_sub] * m_shape[out_lane],)
        out_map_dims = lead + (fused_sub,)
    else:
        pallas_out_shape = tuple(m_shape[d] for d in m_perm)
        out_block = tuple(block[d] for d in m_perm)
        out_map_dims = m_perm
    out_spec = pl.BlockSpec(out_block, make_index_map(out_map_dims))

    # Double-buffered in + out tiles plus transpose intermediates, with
    # headroom, clamped to stay inside each generation's physical VMEM.
    vmem_limit = int(min(vmem_cap, max(32 * _MIB, 3 * padded_cost + 16 * _MIB)))

    out = pl.pallas_call(
        _permute_kernel(m_perm),
        out_shape=jax.ShapeDtypeStruct(pallas_out_shape, x.dtype),
        grid_spec=pltpu.PrefetchScalarGridSpec(
            num_scalar_prefetch=0,
            grid=grid,
            in_specs=[in_spec],
            out_specs=out_spec,
        ),
        compiler_params=pltpu.CompilerParams(
            dimension_semantics=dim_sem,
            vmem_limit_bytes=vmem_limit,
        ),
        cost_estimate=pl.CostEstimate(
            flops=0, transcendentals=0,
            bytes_accessed=2 * x.size * itemsize),
    )(jnp.reshape(x, m_shape))

    return jnp.reshape(out, out_shape_full)


class Permute:
    """JAX/Pallas mirror of cortex_DIM.nn_modules.misc.Permute."""

    def __init__(self, *perm, force_pallas=False):
        self.perm = perm
        self.force_pallas = force_pallas

    def __call__(self, x):
        return pallas_permute(x, self.perm, force_pallas=self.force_pallas)


if __name__ == "__main__":
    key = jax.random.PRNGKey(0)
    k1, k2, k3, k4 = jax.random.split(key, 4)

    def check(x, perm, **kw):
        out = jax.block_until_ready(
            pallas_permute(x, perm, force_pallas=True, **kw))
        ref = jnp.transpose(x, perm)
        assert out.shape == ref.shape and out.dtype == ref.dtype, \
            (out.shape, ref.shape)
        assert jnp.array_equal(out, ref), perm

    # Test 1: NCHW -> NHWC, the cortex_DIM use case (through the module API).
    x = jax.random.normal(k1, (2, 4, 16, 16), dtype=jnp.float32)
    out = jax.block_until_ready(Permute(0, 2, 3, 1, force_pallas=True)(x))
    ref = jnp.transpose(x, (0, 2, 3, 1))
    assert out.shape == ref.shape and out.dtype == ref.dtype
    assert jnp.array_equal(out, ref)

    # Test 2: plain 2D transpose (both lane extents >= 128).
    check(jax.random.normal(k2, (128, 256), dtype=jnp.float32), (1, 0))

    # Test 3: NHWC -> NCHW (narrow *input* lane; masked-load path).
    check(jax.random.normal(k3, (2, 16, 16, 4), dtype=jnp.float32), (0, 3, 1, 2))

    # Test 4: small tile budget to exercise the multi-step parallel grid.
    check(jax.random.normal(k4, (4, 8, 32, 32), dtype=jnp.float32), (0, 2, 3, 1),
          target_block_bytes=64 * 1024)

    print("KERNEL_OK")
</pallas_src>

<mosaic_0001>
module attributes {stable_mosaic.version = 11 : i64} {
  func.func @kernel(%arg0: memref<8x4x128xf32, #tpu.memory_space<vmem>>, %arg1: memref<8x512xf32, #tpu.memory_space<vmem>>) attributes {dimension_semantics = [], scalar_prefetch = 0 : i64, scratch_operands = 0 : i64, tpu.core_type = #tpu.core_type<tc>} {
    %c0 = arith.constant 0 : index
    %c0_0 = arith.constant 0 : index
    %c0_1 = arith.constant 0 : index
    %0 = vector.load %arg0[%c0, %c0_0, %c0_1] : memref<8x4x128xf32, #tpu.memory_space<vmem>>, vector<8x4x128xf32>
    %1 = tpu.transpose %0, [0, 2, 1] : vector<8x4x128xf32> -> vector<8x128x4xf32>
    %2 = vector.shape_cast %1 : vector<8x128x4xf32> to vector<8x512xf32>
    %c0_2 = arith.constant 0 : index
    %c0_3 = arith.constant 0 : index
    %3 = vector.load %arg1[%c0_2, %c0_3] : memref<8x512xf32, #tpu.memory_space<vmem>>, vector<8x512xf32>
    tpu.vector_store %arg1[%c0_2, %c0_3], %2 {strides = array<i32>} : memref<8x512xf32, #tpu.memory_space<vmem>>, vector<8x512xf32>,
    return
  }
}

module attributes {stable_mosaic.version = 11 : i64} {
  func.func @kernel(%arg0: i32, %arg1: memref<2x4x256xf32, #tpu.memory_space<vmem>>, %arg2: memref<2x256x4xf32, #tpu.memory_space<vmem>>) attributes {dimension_semantics = [#tpu.dimension_semantics<arbitrary>], iteration_bounds = array<i64: 1>, scalar_prefetch = 0 : i64, scratch_operands = 0 : i64, tpu.core_type = #tpu.core_type<tc>, window_params = [{pipeline_mode = #tpu.pipeline_mode<synchronous>, transform_indices = @transform_0, window_bounds = array<i64: 2, 4, 256>}, {pipeline_mode = #tpu.pipeline_mode<synchronous>, transform_indices = @transform_1, window_bounds = array<i64: 2, 256, 4>}]} {
    %c0 = arith.constant 0 : index
    %c0_0 = arith.constant 0 : index
    %c0_1 = arith.constant 0 : index
    %0 = vector.load %arg1[%c0, %c0_0, %c0_1] : memref<2x4x256xf32, #tpu.memory_space<vmem>>, vector<2x4x256xf32>
    %1 = tpu.transpose %0, [0, 2, 1] : vector<2x4x256xf32> -> vector<2x256x4xf32>
    %c0_2 = arith.constant 0 : index
    %c0_3 = arith.constant 0 : index
    %c0_4 = arith.constant 0 : index
    %2 = vector.load %arg2[%c0_2, %c0_3, %c0_4] : memref<2x256x4xf32, #tpu.memory_space<vmem>>, vector<2x256x4xf32>
    tpu.vector_store %arg2[%c0_2, %c0_3, %c0_4], %1 {strides = array<i32>} : memref<2x256x4xf32, #tpu.memory_space<vmem>>, vector<2x256x4xf32>,
    return
  }
  func.func @transform_0(%arg0: i32) -> (i32, i32, i32) {
    %c0_i32 = arith.constant 0 : i32
    %c0_i32_0 = arith.constant 0 : i32
    %c0_i32_1 = arith.constant 0 : i32
    %c0_i32_2 = arith.constant 0 : i32
    return %c0_i32, %c0_i32_0, %c0_i32_1 : i32, i32, i32
  }
  func.func @transform_1(%arg0: i32) -> (i32, i32, i32) {
    %c0_i32 = arith.constant 0 : i32
    %c0_i32_0 = arith.constant 0 : i32
    %c0_i32_1 = arith.constant 0 : i32
    %c0_i32_2 = arith.constant 0 : i32
    return %c0_i32, %c0_i32_0, %c0_i32_1 : i32, i32, i32
  }
}

</mosaic_0001>

<bundles_post_ra>
// kernel: tpu_custom_call.1
= control target key start
LH: loop header
LB: loop body
LE: loop exit
PB: predicated region body
PF: predicated region fallthrough
CT: control target
= control target key end

     0   :  { %6 = vsyncpa [#allocation3], 0  ;;  %s5021_s0 = inlined_call_operand.hbm [shape: f32[8,4,128], index: 0, kind: input, shape index: {}]   ;;  %s5022_s1 = inlined_call_operand.hbm [shape: f32[8,512], index: 1, kind: output, shape index: {}]  }
   0x1   :  { %7 = vsyncpa [#allocation4], 0  ;;  %s12_s8 = sshll.u32 %s5021_s0, 4  ;;  %s2842_s9 = smov [#allocation2]   ;;  %s13_s8 = int_to_ptr.hbm [resolvable:$true] %s12_s8 }
   0x2   :  { %s14_s10 = sshll.u32 %s2842_s9, 4  ;;  %s2843_s11 = smov 64   ;;  %s15_s10 = int_to_ptr.vmem [resolvable:$true] %s14_s10 }
   0x3   :  { %s2844_s12 = smov 4  }
   0x4   :  { %20 = dma.hbm_to_vmem [thread:$0]  %s13_s8, 512, %s15_s10, [#allocation3], %s2843_s11, %s2843_s11, %s2844_s12  }
   0x5   :  { %2838 = dma.done.wait [#allocation3], 512  }
   0x6   :  { %2839 = vsyncadd [#allocation3], 4294966784  ;;  %v27_v0 = vld [vmem:[#allocation2 + $0x8] sm:$0xf]  ;;  %v25_v1 = vld [vmem:[#allocation2] sm:$0xf] }
   0x7   :  { %v29_v2 = vld [vmem:[#allocation2 + $0x10] sm:$0xf]  ;;  %97 = vxpose.xlu1.b32.start.end [1/1] (short) %v27_v0, 128  ;;  %33 = vxpose.xlu0.b32.start.end [1/1] (short) %v25_v1, 128  ;;  %v28_v3 = vld [vmem:[#allocation2 + $0xc] sm:$0xf]  ;;  %v26_v4 = vld [vmem:[#allocation2 + $0x4] sm:$0xf] }
   0x8   :  { %161 = vxpose.xlu2.b32.start.end [1/1] (short) %v29_v2, 128  ;;  %v30_v9 = vld [vmem:[#allocation2 + $0x14] sm:$0xf]  ;;  %v32_v33 = vld [vmem:[#allocation2 + $0x1c] sm:$0xf]  ;;  %v31_v34 = vld [vmem:[#allocation2 + $0x18] sm:$0xf] }
   0x9   :  { %vm290_vm0 = vcmask 1047556   ;;  %s2847_s0 = smov 16   ;;  %s2848_s13 = smov 20   ;;  %vm2578_vm1 = vcmask 31744   ;;  %vm2580_vm2 = vcmask 64512   ;;  %vm2582_vm3 = vcmask 97280  }
   0xa   :  { %s2849_s14 = smov 24   ;;  %s2850_s15 = smov 28   ;;  %vm2584_vm4 = vcmask 130048   ;;  %vm2586_vm5 = vcmask 162816   ;;  %vm2588_vm6 = vcmask 195584   ;;  %vm5135_vm7 = vcmask 228352  }
   0xb   :  { %s2851_s16 = smov 12   ;;  %s2852_s17 = smov 32   ;;  %vm5136_vm8 = vcmask 261120   ;;  %vm5133_vm9 = vcmask 293888   ;;  %vm5132_vm10 = vcmask 326656   ;;  %vm5118_vm11 = vcmask 359424  }
   0xc   :  { %s2853_s18 = smov 76   ;;  %s2854_s19 = smov 36   ;;  %vm5117_vm12 = vcmask 392192   ;;  %vm5116_vm13 = vcmask 424960   ;;  %vm2604_vm14 = vcmask 457728   ;;  %vm5119_vm15 = vcmask 490496  }
   0xd   :  { %s2855_s20 = smov 84   ;;  %s2856_s21 = smov 8  }
   0xe   :  { %s2857_s22 = smov 40   ;;  %s2858_s23 = smov 92  }
   0xf   :  { %s2859_s24 = smov 96   ;;  %s2860_s25 = smov 44  }
  0x10   :  { %s2861_s26 = smov 104   ;;  %s2862_s27 = smov 108  }
  0x11   :  { %s2863_s28 = smov 48   ;;  %s5104_s29 = smov 116  }
  0x12   :  { %s2865_s30 = smov 120   ;;  %s2866_s2 = smov 52  }
  0x13   :  { %s2867_s3 = smov 56   ;;  %s2868_s4 = smov 60  }
  0x14   :  { %s2869_s5 = smov 68   ;;  %s2870_s6 = smov 72  }
  0x15   :  { %s2871_s7 = smov 80   ;;  %s2872_s8 = smov 88  }
  0x16   :  { %s2873_s9 = smov 100   ;;  %s2874_s10 = smov 112  }
  0x87   :  { %129 = vxpose.xlu1.b32.start.end [1/1] (short) %v28_v3, 128  ;;  %65 = vxpose.xlu0.b32.start.end [1/1] (short) %v26_v4, 128 }
  0x88   :  { %193 = vxpose.xlu2.b32.start.end [1/1] (short) %v30_v9, 128 }
  0xa1   :  { %v2929_v24 = vpop.trf.xlu2 }
  0xa9   :  { %v2935_v27 = vpop.trf.xlu2 }
  0xab   :  { %v2893_v5 = vpop.trf.xlu1  ;;  %v2895_v6 = vpop.trf.xlu0 }
  0xb1   :  { %v2941_v30 = vpop.trf.xlu2 }
  0xb3   :  { %v2897_v7 = vpop.trf.xlu1  ;;  %v2899_v8 = vpop.trf.xlu0 }
  0xb9   :  { %v2947_v35 = vpop.trf.xlu2 }
  0xbb   :  { %v2901_v10 = vpop.trf.xlu1  ;;  %v2903_v11 = vpop.trf.xlu0 }
  0xc1   :  { %v2953_v38 = vpop.trf.xlu2 }
  0xc3   :  { %v2905_v12 = vpop.trf.xlu1  ;;  %v2907_v13 = vpop.trf.xlu0 }
  0xc9   :  { %v2959_v41 = vpop.trf.xlu2 }
  0xca   :  { %5153 = vst [vmem:[#allocation24_spill] sm:$0xff] %v2959_v41 }
  0xcb   :  { %v2909_v14 = vpop.trf.xlu1  ;;  %v2911_v15 = vpop.trf.xlu0 }
  0xd1   :  { %v2965_v44 = vpop.trf.xlu2 }
  0xd2   :  { %5156 = vst [vmem:[#allocation27_spill] sm:$0xff] %v2965_v44 }
  0xd3   :  { %v2913_v16 = vpop.trf.xlu1  ;;  %v2915_v17 = vpop.trf.xlu0 }
  0xd9   :  { %v2971_v47 = vpop.trf.xlu2 }
  0xda   :  { %5159 = vst [vmem:[#allocation30_spill] sm:$0xff] %v2971_v47 }
  0xdb   :  { %v2917_v18 = vpop.trf.xlu1  ;;  %v2919_v19 = vpop.trf.xlu0 }
  0xdc   :  { %5137 = vst [vmem:[#allocation8_spill] sm:$0xff] %v2917_v18 }
  0xdd   :  { %5138 = vst [vmem:[#allocation9_spill] sm:$0xff] %v2919_v19 }
  0xe1   :  { %v2977_v50 = vpop.trf.xlu2 }
  0xe2   :  { %5160 = vst [vmem:[#allocation31_spill] sm:$0xff] %v2977_v50 }
  0xe3   :  { %v2921_v20 = vpop.trf.xlu1  ;;  %v2923_v21 = vpop.trf.xlu0 }
  0xe4   :  { %5139 = vst [vmem:[#allocation10_spill] sm:$0xff] %v2921_v20 }
  0xe5   :  { %5140 = vst [vmem:[#allocation11_spill] sm:$0xff] %v2923_v21 }
  0xe9   :  { %v2983_v53 = vpop.trf.xlu2 }
  0xea   :  { %5161 = vst [vmem:[#allocation32_spill] sm:$0xff] %v2983_v53 }
  0xeb   :  { %v2925_v22 = vpop.trf.xlu1  ;;  %v2927_v23 = vpop.trf.xlu0 }
  0xec   :  { %5141 = vst [vmem:[#allocation12_spill] sm:$0xff] %v2925_v22 }
  0xed   :  { %5142 = vst [vmem:[#allocation13_spill] sm:$0xff] %v2927_v23 }
  0xf1   :  { %v2989_v56 = vpop.trf.xlu2 }
  0xf2   :  { %5162 = vst [vmem:[#allocation33_spill] sm:$0xff] %v2989_v56 }
  0xf3   :  { %v2931_v25 = vpop.trf.xlu1  ;;  %v2933_v26 = vpop.trf.xlu0 }
  0xf4   :  { %5143 = vst [vmem:[#allocation14_spill] sm:$0xff] %v2931_v25 }
  0xf5   :  { %5144 = vst [vmem:[#allocation15_spill] sm:$0xff] %v2933_v26 }
  0xf9   :  { %v2995_v59 = vpop.trf.xlu2 }
  0xfa   :  { %5163 = vst [vmem:[#allocation34_spill] sm:$0xff] %v2995_v59 }
  0xfb   :  { %v2937_v28 = vpop.trf.xlu1  ;;  %v2939_v29 = vpop.trf.xlu0 }
  0xfc   :  { %5145 = vst [vmem:[#allocation16_spill] sm:$0xff] %v2937_v28 }
  0xfd   :  { %5146 = vst [vmem:[#allocation17_spill] sm:$0xff] %v2939_v29 }
 0x101   :  { %v3001_v62 = vpop.trf.xlu2 }
 0x102   :  { %5164 = vst [vmem:[#allocation35_spill] sm:$0xff] %v3001_v62 }
 0x103   :  { %v2943_v31 = vpop.trf.xlu1  ;;  %v2945_v32 = vpop.trf.xlu0 }
 0x104   :  { %5147 = vst [vmem:[#allocation18_spill] sm:$0xff] %v2943_v31 }
 0x105   :  { %5148 = vst [vmem:[#allocation19_spill] sm:$0xff] %v2945_v32 }
 0x107   :  { %257 = vxpose.xlu1.b32.start.end [1/1] (short) %v32_v33, 128  ;;  %225 = vxpose.xlu0.b32.start.end [1/1] (short) %v31_v34, 128 }
 0x109   :  { %v3007_v1 = vpop.trf.xlu2 }
 0x10a   :  { %5167 = vst [vmem:[#allocation38_spill] sm:$0xff] %v3007_v1 }
 0x10b   :  { %v2949_v36 = vpop.trf.xlu1  ;;  %v2951_v37 = vpop.trf.xlu0 }
 0x10c   :  { %5149 = vst [vmem:[#allocation20_spill] sm:$0xff] %v2949_v36 }
 0x10d   :  { %5150 = vst [vmem:[#allocation21_spill] sm:$0xff] %v2951_v37 }
 0x111   :  { %v3013_v4 = vpop.trf.xlu2 }
 0x112   :  { %5170 = vst [vmem:[#allocation41_spill] sm:$0xff] %v3013_v4 }
 0x113   :  { %v2955_v39 = vpop.trf.xlu1  ;;  %v2957_v40 = vpop.trf.xlu0 }
 0x114   :  { %5151 = vst [vmem:[#allocation22_spill] sm:$0xff] %v2955_v39 }
 0x115   :  { %5152 = vst [vmem:[#allocation23_spill] sm:$0xff] %v2957_v40 }
 0x119   :  { %v3019_v34 = vpop.trf.xlu2 }
 0x11a   :  { %5173 = vst [vmem:[#allocation44_spill] sm:$0xff] %v3019_v34 }
 0x11b   :  { %v2961_v42 = vpop.trf.xlu1  ;;  %v2963_v43 = vpop.trf.xlu0 }
 0x11c   :  { %5154 = vst [vmem:[#allocation25_spill] sm:$0xff] %v2961_v42 }
 0x11d   :  { %5155 = vst [vmem:[#allocation26_spill] sm:$0xff] %v2963_v43 }
 0x121   :  { %v209_v43 = vpop.trf.xlu2 }
 0x123   :  { %v2967_v45 = vpop.trf.xlu1  ;;  %v2969_v46 = vpop.trf.xlu0 }
 0x124   :  { %5157 = vst [vmem:[#allocation28_spill] sm:$0xff] %v2967_v45 }
 0x125   :  { %5158 = vst [vmem:[#allocation29_spill] sm:$0xff] %v2969_v46 }
 0x129   :  { %v3033_v37 = vpop.trf.xlu2 }
 0x12b   :  { %v2973_v48 = vpop.trf.xlu1  ;;  %v2975_v49 = vpop.trf.xlu0 }
 0x131   :  { %v3039_v32 = vpop.trf.xlu2 }
 0x133   :  { %v2979_v51 = vpop.trf.xlu1  ;;  %v2981_v52 = vpop.trf.xlu0 }
 0x139   :  { %v3045_v28 = vpop.trf.xlu2 }
 0x13b   :  { %v2985_v54 = vpop.trf.xlu1  ;;  %v2987_v55 = vpop.trf.xlu0 }
 0x143   :  { %v2991_v57 = vpop.trf.xlu1  ;;  %v2993_v58 = vpop.trf.xlu0 }
 0x14b   :  { %v2997_v60 = vpop.trf.xlu1  ;;  %v2999_v61 = vpop.trf.xlu0 }
 0x153   :  { %v3003_v63 = vpop.trf.xlu1  ;;  %v3005_v0 = vpop.trf.xlu0 }
 0x154   :  { %5165 = vst [vmem:[#allocation36_spill] sm:$0xff] %v3003_v63 }
 0x155   :  { %5166 = vst [vmem:[#allocation37_spill] sm:$0xff] %v3005_v0 }
 0x15b   :  { %v3009_v2 = vpop.trf.xlu1  ;;  %v3011_v3 = vpop.trf.xlu0 }
 0x15c   :  { %5168 = vst [vmem:[#allocation39_spill] sm:$0xff] %v3009_v2 }
 0x15d   :  { %5169 = vst [vmem:[#allocation40_spill] sm:$0xff] %v3011_v3 }
 0x163   :  { %v3015_v9 = vpop.trf.xlu1  ;;  %v3017_v33 = vpop.trf.xlu0 }
 0x164   :  { %5171 = vst [vmem:[#allocation42_spill] sm:$0xff] %v3015_v9 }
 0x165   :  { %5172 = vst [vmem:[#allocation43_spill] sm:$0xff] %v3017_v33 }
 0x16b   :  { %v3021_v46 = vpop.trf.xlu1  ;;  %v3023_v45 = vpop.trf.xlu0 }
 0x16c   :  { %5174 = vst [vmem:[#allocation45_spill] sm:$0xff] %v3021_v46 }
 0x16d   :  { %5175 = vst [vmem:[#allocation46_spill] sm:$0xff] %v3023_v45  ;;  %v2846_v45 = vmov 1934713408  }
 0x16e   :  { %v343_v23 = vunpack.c.l.s4 %v2846_v45 }
 0x173   :  { %v3025_v42 = vpop.trf.xlu1  ;;  %v3027_v40 = vpop.trf.xlu0 }
 0x174   :  { %5176 = vst [vmem:[#allocation47_spill] sm:$0xff] %v3025_v42  ;;  %v328_v42 = vrot.slane %v209_v43, 4 }
 0x175   :  { %5177 = vst [vmem:[#allocation48_spill] sm:$0xff] %v3027_v40 }
 0x17b   :  { %v3029_v39 = vpop.trf.xlu1  ;;  %v3031_v62 = vpop.trf.xlu0 }
 0x17c   :  { %5178 = vst [vmem:[#allocation49_spill] sm:$0xff] %v3029_v39  ;;  %v3051_v39 = vpop.trf.xlu2 }
 0x17d   :  { %5179 = vst [vmem:[#allocation50_spill] sm:$0xff] %v3031_v62 }
 0x183   :  { %v3035_v59 = vpop.trf.xlu1  ;;  %v3037_v36 = vpop.trf.xlu0 }
 0x184   :  { %5180 = vst [vmem:[#allocation51_spill] sm:$0xff] %v3035_v59  ;;  %v2845_v59 = vmov 1983009808   ;;  %v3064_v25 = vpop.trf.xlu2 }
 0x185   :  { %5181 = vst [vmem:[#allocation52_spill] sm:$0xff] %v3037_v36  ;;  %v302_v36 = vrot.slane %v2973_v48, 4  ;;  %v295_v40 = vunpack.c.l.s4 %v2845_v59 }
 0x18b   :  { %v3041_v31 = vpop.trf.xlu1  ;;  %v3043_v29 = vpop.trf.xlu0 }
 0x18c   :  { %5182 = vst [vmem:[#allocation53_spill] sm:$0xff] %v3041_v31  ;;  %v3085_v33 = vpop.trf.xlu2 }
 0x18d   :  { %5183 = vst [vmem:[#allocation54_spill] sm:$0xff] %v3043_v29 }
 0x18e   :  { %5190 = vst [vmem:[#allocation61_spill] sm:$0xff] %v3085_v33 }
 0x193   :  { %v3047_v56 = vpop.trf.xlu1  ;;  %v3049_v53 = vpop.trf.xlu0 }
 0x194   :  { %5184 = vst [vmem:[#allocation55_spill] sm:$0xff] %v3047_v56  ;;  %v303_v56 = vsel %vm290_vm0, %v302_v36, %v2975_v49  ;;  %v304_v36 = vrot.slane %v2975_v49, 4  ;;  %v3123_v9 = vpop.trf.xlu2 }
 0x195   :  { %5185 = vst [vmem:[#allocation56_spill] sm:$0xff] %v3049_v53  ;;  %v3066_v53 = vunpack.c.0.s8 %v295_v40 }
 0x196   :  { %v305_v49 = vsel %vm290_vm0, %v2973_v48, %v304_v36  ;;  %5193 = vst [vmem:[#allocation64_spill] sm:$0xff] %v3123_v9 }
 0x19b   :  { %v3053_v62 = vpop.trf.xlu1  ;;  %v3055_v26 = vpop.trf.xlu0 }
 0x19c   :  { %5186 = vst [vmem:[#allocation57_spill] sm:$0xff] %v3053_v62  ;;  %v289_v62 = vrot.slane %v2893_v5, 4 }
 0x19d   :  { %5187 = vst [vmem:[#allocation58_spill] sm:$0xff] %v3055_v26  ;;  %v3070_v26 = vperm.slane %v303_v56, %v3066_v53 }
 0x19e   :  { %v291_v59 = vsel %vm290_vm0, %v289_v62, %v2895_v6  ;;  %v316_v62 = vrot.slane %v2929_v24, 4 }
 0x19f   :  { %v3078_v21 = vperm.slane %v291_v59, %v3066_v53  ;;  %v3095_v59 = vunpack.c.0.s8 %v343_v23 }
 0x1a3   :  { %v3058_v31 = vpop.trf.xlu1  ;;  %v3060_v29 = vpop.trf.xlu0 }
 0x1a4   :  { %5188 = vst [vmem:[#allocation59_spill] sm:$0xff] %v3058_v31  ;;  %v338_v31 = vrot.slane %v3070_v26, 4 }
 0x1a5   :  { %5189 = vst [vmem:[#allocation60_spill] sm:$0xff] %v3060_v29 }
 0x1ab   :  { %v273_v50 = vpop.trf.xlu1  ;;  %v241_v29 = vpop.trf.xlu0 }
 0x1ac   :  { %v326_v22 = vrot.slane %v273_v50, 4  ;;  %v329_v40 = vsel %vm290_vm0, %v273_v50, %v328_v42  ;;  %v314_v46 = vrot.slane %v241_v29, 4  ;;  %v339_v42 = vsel %vm290_vm0, %v338_v31, %v3078_v21 }
 0x1ad   :  { %v337_v56 = vperm.slane %v329_v40, %v3066_v53  ;;  %v317_v50 = vsel %vm290_vm0, %v241_v29, %v316_v62  ;;  %v313_v31 = vperm.slane %v305_v49, %v3066_v53 }
 0x1ae   :  { %v327_v47 = vsel %vm290_vm0, %v326_v22, %v209_v43  ;;  %v315_v20 = vsel %vm290_vm0, %v314_v46, %v2929_v24  ;;  %v292_v43 = vrot.slane %v2895_v6, 4  ;;  %v3103_v46 = vperm.slane %v339_v42, %v3095_v59 }
 0x1af   :  { %v3088_v45 = vperm.slane %v327_v47, %v3066_v53  ;;  %v374_v40 = vrot.slane %v337_v56, 4  ;;  %v3098_v22 = vperm.slane %v315_v20, %v3066_v53  ;;  %v325_v47 = vperm.slane %v317_v50, %v3066_v53 }
 0x1b0   :  { %5191 = vst [vmem:[#allocation62_spill] sm:$0xff] %v3103_v46  ;;  %v293_v6 = vsel %vm290_vm0, %v2893_v5, %v292_v43  ;;  %v388_v62 = vrot.slane %v3103_v46, 4  ;;  %v350_v42 = vrot.slane %v313_v31, 4 }
 0x1b1   :  { %v362_v24 = vrot.slane %v3088_v45, 4  ;;  %v375_v20 = vsel %vm290_vm0, %v374_v40, %v325_v47 }
 0x1b2   :  { %v381_v50 = vperm.slane %v375_v20, %v3095_v59  ;;  %v376_v20 = vrot.slane %v325_v47, 4 }
 0x1b3   :  { %v3107_v48 = vpop.trf.xlu1  ;;  %v3109_v29 = vpop.trf.xlu0  ;;  %v363_v23 = vsel %vm290_vm0, %v362_v24, %v3098_v22  ;;  %v301_v24 = vperm.slane %v293_v6, %v3066_v53  ;;  %v526_v6 = vrot.slane %v2985_v54, 4 }
 0x1b4   :  { %v3115_v36 = vperm.slane %v363_v23, %v3095_v59  ;;  %v394_v43 = vrot.slane %v381_v50, 4  ;;  %v438_v47 = vrot.slane %v3107_v48, 4 }
 0x1b5   :  { %v351_v5 = vsel %vm290_vm0, %v350_v42, %v301_v24 }
 0x1b6   :  { %5192 = vst [vmem:[#allocation63_spill] sm:$0xff] %v3115_v36  ;;  %v389_v49 = vsel %vm290_vm0, %v3115_v36, %v388_v62  ;;  %v357_v46 = vperm.slane %v351_v5, %v3095_v59  ;;  %v377_v5 = vsel %vm290_vm0, %v337_v56, %v376_v20  ;;  %v439_v20 = vsel %vm290_vm0, %v438_v47, %v3033_v37 }
 0x1b7   :  { %2083 = vrot.lane.b32.xlu2 %v389_v49, %s2844_s12  ;;  %v3137_v49 = vpop.trf.xlu2  ;;  %v385_v33 = vperm.slane %v377_v5, %v3095_v59  ;;  %v426_v5 = vrot.slane %v3109_v29, 4  ;;  %v3177_v19 = vperm.slane %v439_v20, %v3066_v53 }
 0x1b8   :  { %v395_v62 = vsel %vm290_vm0, %v394_v43, %v357_v46  ;;  %5194 = vst [vmem:[#allocation65_spill] sm:$0xff] %v3137_v49  ;;  %v527_v43 = vsel %vm290_vm0, %v526_v6, %v2987_v55  ;;  %v396_v44 = vrot.slane %v357_v46, 4  ;;  %v514_v49 = vrot.slane %v2901_v10, 4 }
 0x1b9   :  { %v533_v56 = vperm.slane %v527_v43, %v3066_v53  ;;  %v340_v6 = vrot.slane %v3078_v21, 4  ;;  %v398_v43 = vrot.slane %v385_v33, 4  ;;  %v364_v21 = vrot.slane %v3098_v22, 4 }
 0x1ba   :  { %v397_v4 = vsel %vm290_vm0, %v381_v50, %v396_v44  ;;  %v528_v22 = vrot.slane %v2987_v55, 4  ;;  %v427_v20 = vsel %vm290_vm0, %v426_v5, %v2935_v27 }
 0x1bb   :  { %v3127_v40 = vpop.trf.xlu1  ;;  %v3129_v23 = vpop.trf.xlu0  ;;  %v341_v18 = vsel %vm290_vm0, %v3070_v26, %v340_v6  ;;  %v365_v26 = vsel %vm290_vm0, %v3088_v45, %v364_v21  ;;  %v3207_v5 = vperm.slane %v427_v20, %v3066_v53 }
 0x1bc   :  { %v550_v34 = vrot.slane %v3127_v40, 4  ;;  %v529_v45 = vsel %vm290_vm0, %v2985_v54, %v528_v22 }
 0x1be   :  { %v551_v42 = vsel %vm290_vm0, %v550_v34, %v3039_v32  ;;  %v352_v34 = vrot.slane %v301_v24, 4  ;;  %v515_v24 = vsel %vm290_vm0, %v514_v49, %v2903_v11 }
 0x1bf   :  { %2095 = vrot.lane.b32.xlu2 %v395_v62, %s2847_s0  ;;  %v538_v62 = vrot.slane %v3129_v23, 4  ;;  %v3151_v3 = vperm.slane %v551_v42, %v3066_v53  ;;  %v3173_v47 = vpop.trf.xlu2  ;;  %v521_v49 = vperm.slane %v515_v24, %v3066_v53 }
 0x1c0   :  { %v353_v50 = vsel %vm290_vm0, %v313_v31, %v352_v34  ;;  %5195 = vst [vmem:[#allocation66_spill] sm:$0xff] %v3173_v47  ;;  %v402_v34 = vrot.slane %v2897_v7, 4 }
 0x1c1   :  { %v539_v46 = vsel %vm290_vm0, %v538_v62, %v2941_v30  ;;  %v586_v42 = vrot.slane %v3151_v3, 4  ;;  %v562_v62 = vrot.slane %v533_v56, 4  ;;  %v361_v31 = vperm.slane %v353_v50, %v3095_v59 }
 0x1c2   :  { %v545_v1 = vperm.slane %v539_v46, %v3066_v53  ;;  %v474_v50 = vrot.slane %v3177_v19, 4  ;;  %v403_v24 = vsel %vm290_vm0, %v402_v34, %v2899_v8  ;;  %v564_v21 = vrot.slane %v521_v49, 4 }
 0x1c3   :  { %v3139_v36 = vpop.trf.xlu1  ;;  %v3141_v9 = vpop.trf.xlu0  ;;  %v399_v46 = vsel %vm290_vm0, %v398_v43, %v361_v31  ;;  %v563_v6 = vsel %vm290_vm0, %v562_v62, %v521_v49  ;;  %v400_v63 = vrot.slane %v361_v31, 4 }
 0x1c4   :  { %v587_v0 = vsel %vm290_vm0, %v586_v42, %v545_v1  ;;  %v3198_v42 = vperm.slane %v341_v18, %v3095_v59  ;;  %v552_v18 = vrot.slane %v3039_v32, 4  ;;  %v569_v62 = vperm.slane %v563_v6, %v3095_v59 }
 0x1c5   :  { %v593_v55 = vperm.slane %v587_v0, %v3095_v59  ;;  %v3217_v0 = vperm.slane %v365_v26, %v3095_v59  ;;  %v588_v34 = vrot.slane %v545_v1, 4  ;;  %v475_v20 = vsel %vm290_vm0, %v474_v50, %v3207_v5 }
 0x1c6   :  { %v553_v41 = vsel %vm290_vm0, %v3127_v40, %v552_v18  ;;  %v392_v54 = vrot.slane %v3198_v42, 4  ;;  %v3229_v26 = vperm.slane %v403_v24, %v3066_v53  ;;  %v565_v1 = vsel %vm290_vm0, %v533_v56, %v564_v21 }
 0x1c7   :  { %2099 = vrot.lane.b32.xlu2 %v397_v4, %s2848_s13  ;;  %v414_v4 = vrot.slane %v2979_v51, 4  ;;  %v3226_v22 = vpop.trf.xlu2  ;;  %v610_v32 = vrot.slane %v593_v55, 4  ;;  %v401_v49 = vsel %vm290_vm0, %v385_v33, %v400_v63  ;;  %v3240_v31 = vperm.slane %v475_v20, %v3095_v59 }
 0x1c8   :  { %5196 = vst [vmem:[#allocation67_spill] sm:$0xff] %v3226_v22  ;;  %v393_v40 = vsel %vm290_vm0, %v3217_v0, %v392_v54  ;;  %v612_v50 = vrot.slane %v569_v62, 4  ;;  %v540_v18 = vrot.slane %v2941_v30, 4  ;;  %v3246_v22 = vperm.slane %v553_v41, %v3066_v53 }
 0x1c9   :  { %v415_v47 = vsel %vm290_vm0, %v414_v4, %v2981_v52  ;;  %v589_v63 = vsel %vm290_vm0, %v3151_v3, %v588_v34  ;;  %v662_v33 = vrot.slane %v3139_v36, 4  ;;  %v3254_v56 = vperm.slane %v565_v1, %v3095_v59 }
 0x1ca   :  { %v3204_v4 = vperm.slane %v415_v47, %v3066_v53  ;;  %v516_v47 = vrot.slane %v2903_v11, 4  ;;  %v3233_v11 = vperm.slane %v529_v45, %v3066_v53  ;;  %v3260_v30 = vsel %vm290_vm0, %v593_v55, %v612_v50 }
 0x1cb   :  { %v3164_v2 = vpop.trf.xlu1  ;;  %v3166_v44 = vpop.trf.xlu0  ;;  %5197 = vst [vmem:[#allocation68_spill] sm:$0xff] %v3254_v56  ;;  %v541_v21 = vsel %vm290_vm0, %v3129_v23, %v540_v18  ;;  %v498_v34 = vrot.slane %v3240_v31, 4  ;;  %v598_v20 = vrot.slane %v3246_v22, 4  ;;  %v663_v54 = vsel %vm290_vm0, %v662_v33, %v3045_v28 }
 0x1cc   :  { %v450_v6 = vrot.slane %v3204_v4, 4  ;;  %v517_v24 = vsel %vm290_vm0, %v2901_v10, %v516_v47  ;;  %v3257_v10 = vsel %vm290_vm0, %v610_v32, %v569_v62  ;;  %v574_v41 = vrot.slane %v3233_v11, 4 }
 0x1cd   :  { %v3273_v62 = vperm.slane %v589_v63, %v3095_v59  ;;  %v525_v55 = vperm.slane %v517_v24, %v3066_v53  ;;  %v650_v32 = vrot.slane %v3141_v9, 4  ;;  %v404_v23 = vrot.slane %v2899_v8, 4 }
 0x1ce   :  { %v451_v3 = vsel %vm290_vm0, %v450_v6, %v3229_v26  ;;  %v616_v6 = vrot.slane %v3254_v56, 4  ;;  %v638_v24 = vrot.slane %v2991_v57, 4  ;;  %v476_v18 = vrot.slane %v3207_v5, 4 }
 0x1cf   :  { %2103 = vrot.lane.b32.xlu2 %v399_v46, %s2849_s14  ;;  %v457_v1 = vperm.slane %v451_v3, %v3095_v59  ;;  %v575_v50 = vsel %vm290_vm0, %v574_v41, %v525_v55  ;;  %v3291_v3 = vpop.trf.xlu2  ;;  %v669_v8 = vperm.slane %v663_v54, %v3066_v53  ;;  %v651_v5 = vsel %vm290_vm0, %v650_v32, %v2947_v35 }
 0x1d0   :  { %v617_v33 = vsel %vm290_vm0, %v3273_v62, %v616_v6  ;;  %5198 = vst [vmem:[#allocation69_spill] sm:$0xff] %v3291_v3  ;;  %v3300_v41 = vperm.slane %v575_v50, %v3095_v59  ;;  %v452_v6 = vrot.slane %v3229_v26, 4  ;;  %v477_v50 = vsel %vm290_vm0, %v3177_v19, %v476_v18 }
 0x1d1   :  { %v499_v63 = vsel %vm290_vm0, %v498_v34, %v457_v1  ;;  %v628_v3 = vrot.slane %v2907_v13, 4  ;;  %v500_v26 = vrot.slane %v457_v1, 4  ;;  %v3331_v19 = vperm.slane %v477_v50, %v3095_v59 }
 0x1d2   :  { %v390_v18 = vrot.slane %v3217_v0, 4  ;;  %v664_v50 = vrot.slane %v3045_v28, 4 }
 0x1d3   :  { %v3209_v43 = vpop.trf.xlu1  ;;  %v3211_v46 = vpop.trf.xlu0 }
 0x1d4   :  { %v665_v28 = vsel %vm290_vm0, %v3139_v36, %v664_v50  ;;  %v750_v36 = vrot.slane %v2997_v60, 4 }
 0x1d7   :  { %2107 = vrot.lane.b32.xlu2 %v401_v49, %s2850_s15  ;;  %v626_v49 = vrot.slane %v2905_v12, 4  ;;  %v3352_v0 = vpop.trf.xlu2 }
 0x1d8   :  { %5201 = vst [vmem:[#allocation72_spill] sm:$0xff] %v3352_v0 }
 0x1d9   :  { %2091 = vrot.lane.b32.xlu1 %v393_v40, %s2851_s16  ;;  %v549_v40 = vperm.slane %v541_v21, %v3066_v53  ;;  %v3304_v21 = vsel %vm290_vm0, %v2897_v7, %v404_v23  ;;  %v627_v34 = vsel %vm290_vm0, %v626_v49, %v2907_v13  ;;  %v576_v7 = vrot.slane %v525_v55, 4 }
 0x1da   :  { %v657_v49 = vperm.slane %v651_v5, %v3066_v53  ;;  %v501_v13 = vsel %vm290_vm0, %v3240_v31, %v500_v26  ;;  %v416_v31 = vrot.slane %v2981_v52, 4 }
 0x1db   :  { %v3263_v45 = vpop.trf.xlu1  ;;  %v3265_v47 = vpop.trf.xlu0  ;;  %v599_v56 = vsel %vm290_vm0, %v598_v20, %v549_v40  ;;  %v600_v23 = vrot.slane %v549_v40, 4  ;;  %v577_v55 = vsel %vm290_vm0, %v3233_v11, %v576_v7  ;;  %v440_v40 = vrot.slane %v3033_v37, 4 }
 0x1dc   :  { %v3316_v32 = vperm.slane %v599_v56, %v3095_v59  ;;  %v700_v5 = vrot.slane %v657_v49, 4 }
 0x1dd   :  { %v601_v37 = vsel %vm290_vm0, %v3246_v22, %v600_v23 }
 0x1de   :  { %v3370_v23 = vperm.slane %v601_v37, %v3095_v59 }
 0x1df   :  { %2111 = vrot.lane.b32.xlu2 %v499_v63, %s2852_s17  ;;  %v639_v63 = vsel %vm290_vm0, %v638_v24, %v2993_v58  ;;  %v640_v24 = vrot.slane %v2993_v58, 4  ;;  %v428_v58 = vrot.slane %v2935_v27, 4  ;;  %v453_v27 = vsel %vm290_vm0, %v3204_v4, %v452_v6 }
 0x1e0   :  { %v3328_v56 = vperm.slane %v639_v63, %v3066_v53  ;;  %v652_v4 = vrot.slane %v2947_v35, 4  ;;  %v391_v6 = vsel %vm290_vm0, %v390_v18, %v3198_v42  ;;  %v461_v35 = vperm.slane %v453_v27, %v3095_v59 }
 0x1e1   :  { %2155 = vrot.lane.b32.xlu1 %v617_v33, %s2853_s18  ;;  %v698_v33 = vrot.slane %v669_v8, 4  ;;  %v641_v63 = vsel %vm290_vm0, %v2991_v57, %v640_v24  ;;  %v417_v42 = vsel %vm290_vm0, %v2979_v51, %v416_v31  ;;  %v673_v51 = vperm.slane %v665_v28, %v3066_v53 }
 0x1e2   :  { %v674_v22 = vrot.slane %v3328_v56, 4  ;;  %v3386_v26 = vperm.slane %v641_v63, %v3066_v53  ;;  %v653_v24 = vsel %vm290_vm0, %v3141_v9, %v652_v4  ;;  %v774_v31 = vrot.slane %v3164_v2, 4 }
 0x1e3   :  { %v3308_v20 = vpop.trf.xlu1  ;;  %v3310_v54 = vpop.trf.xlu0  ;;  %v699_v11 = vsel %vm290_vm0, %v698_v33, %v657_v49  ;;  %v701_v49 = vsel %vm290_vm0, %v669_v8, %v700_v5  ;;  %v3404_v5 = vperm.slane %v3304_v21, %v3066_v53  ;;  %v661_v37 = vperm.slane %v653_v24, %v3066_v53 }
 0x1e4   :  { %5199 = vst [vmem:[#allocation70_spill] sm:$0xff] %v3308_v20  ;;  %v620_v20 = vrot.slane %v3300_v41, 4  ;;  %v3373_v57 = vperm.slane %v699_v11, %v3095_v59  ;;  %v709_v9 = vperm.slane %v701_v49, %v3095_v59  ;;  %v629_v11 = vsel %vm290_vm0, %v2905_v12, %v628_v3 }
 0x1e5   :  { %5200 = vst [vmem:[#allocation71_spill] sm:$0xff] %v3310_v54  ;;  %v3323_v54 = vperm.slane %v627_v34, %v3066_v53  ;;  %v441_v34 = vsel %vm290_vm0, %v3107_v48, %v440_v40  ;;  %v502_v48 = vrot.slane %v3331_v19, 4  ;;  %v429_v40 = vsel %vm290_vm0, %v3109_v29, %v428_v58 }
 0x1e6   :  { %v621_v1 = vsel %vm290_vm0, %v3316_v32, %v620_v20  ;;  %v3355_v20 = vperm.slane %v577_v55, %v3095_v59  ;;  %v3376_v33 = vperm.slane %v441_v34, %v3066_v53  ;;  %v722_v18 = vrot.slane %v3373_v57, 4 }
 0x1e7   :  { %2115 = vrot.lane.b32.xlu2 %v501_v13, %s2854_s19  ;;  %v503_v13 = vsel %vm290_vm0, %v502_v48, %v461_v35  ;;  %v675_v8 = vsel %vm290_vm0, %v674_v22, %v3323_v54  ;;  %v676_v29 = vrot.slane %v3323_v54, 4  ;;  %v762_v21 = vrot.slane %v3166_v44, 4 }
 0x1e8   :  { %v624_v55 = vrot.slane %v3355_v20, 4  ;;  %v486_v58 = vrot.slane %v3376_v33, 4  ;;  %v3416_v34 = vperm.slane %v675_v8, %v3095_v59  ;;  %v3419_v54 = vperm.slane %v417_v42, %v3066_v53 }
 0x1e9   :  { %2163 = vrot.lane.b32.xlu1 %v621_v1, %s2855_s20  ;;  %v686_v27 = vrot.slane %v3386_v26, 4  ;;  %v3423_v63 = vperm.slane %v429_v40, %v3066_v53  ;;  %v677_v12 = vsel %vm290_vm0, %v3328_v56, %v676_v29  ;;  %v751_v3 = vsel %vm290_vm0, %v750_v36, %v2999_v61  ;;  %v3440_v56 = vpop.trf.xlu2 }
 0x1ea   :  { %v625_v1 = vsel %vm290_vm0, %v3370_v23, %v624_v55  ;;  %v710_v48 = vrot.slane %v673_v51, 4  ;;  %v723_v4 = vsel %vm290_vm0, %v722_v18, %v3416_v34  ;;  %v637_v28 = vperm.slane %v629_v11, %v3066_v53  ;;  %5202 = vst [vmem:[#allocation73_spill] sm:$0xff] %v3440_v56 }
 0x1eb   :  { %v3361_v7 = vpop.trf.xlu1  ;;  %v3363_v52 = vpop.trf.xlu0  ;;  %v738_v49 = vrot.slane %v2909_v14, 4  ;;  %v487_v42 = vsel %vm290_vm0, %v486_v58, %v3423_v63  ;;  %v712_v24 = vrot.slane %v661_v37, 4  ;;  %v775_v55 = vsel %vm290_vm0, %v774_v31, %v3051_v39 }
 0x1ec   :  { %v763_v36 = vsel %vm290_vm0, %v762_v21, %v2953_v38  ;;  %v504_v40 = vrot.slane %v461_v35, 4  ;;  %v462_v8 = vrot.slane %v3419_v54, 4  ;;  %v776_v18 = vrot.slane %v3051_v39, 4 }
 0x1ed   :  { %2087 = vrot.lane.b32.xlu0 %v391_v6, %s2856_s21  ;;  %v726_v6 = vrot.slane %v709_v9, 4  ;;  %v687_v29 = vsel %vm290_vm0, %v686_v27, %v637_v28  ;;  %v711_v58 = vsel %vm290_vm0, %v710_v48, %v661_v37  ;;  %v3458_v35 = vperm.slane %v487_v42, %v3095_v59 }
 0x1ee   :  { %v505_v11 = vsel %vm290_vm0, %v3331_v19, %v504_v40  ;;  %v740_v21 = vrot.slane %v2911_v15, 4  ;;  %v769_v39 = vperm.slane %v763_v36, %v3066_v53  ;;  %v739_v19 = vsel %vm290_vm0, %v738_v49, %v2911_v15 }
 0x1ef   :  { %2119 = vrot.lane.b32.xlu2 %v503_v13, %s2857_s22  ;;  %v685_v13 = vperm.slane %v677_v12, %v3095_v59  ;;  %v713_v12 = vsel %vm290_vm0, %v673_v51, %v712_v24  ;;  %v777_v37 = vsel %vm290_vm0, %v3164_v2, %v776_v18  ;;  %v3471_v48 = vperm.slane %v687_v29, %v3095_v59 }
 0x1f0   :  { %v688_v51 = vrot.slane %v637_v28, 4  ;;  %v506_v2 = vrot.slane %v3458_v35, 4  ;;  %v3484_v49 = vperm.slane %v711_v58, %v3095_v59  ;;  %v3487_v28 = vperm.slane %v713_v12, %v3095_v59 }
 0x1f1   :  { %2171 = vrot.lane.b32.xlu1 %v625_v1, %s2858_s23  ;;  %v3449_v1 = vperm.slane %v751_v3, %v3066_v53  ;;  %v727_v31 = vsel %vm290_vm0, %v726_v6, %v685_v13  ;;  %v781_v3 = vperm.slane %v775_v55, %v3066_v53  ;;  %v728_v27 = vrot.slane %v685_v13, 4 }
 0x1f2   :  { %v463_v55 = vsel %vm290_vm0, %v462_v8, %v3404_v5  ;;  %v3491_v36 = vperm.slane %v777_v37, %v3066_v53  ;;  %v812_v13 = vrot.slane %v769_v39, 4  ;;  %v764_v8 = vrot.slane %v2953_v38, 4 }
 0x1f3   :  { %v3425_v22 = vpop.trf.xlu1  ;;  %v3427_v50 = vpop.trf.xlu0  ;;  %v786_v6 = vrot.slane %v3449_v1, 4  ;;  %v729_v15 = vsel %vm290_vm0, %v709_v9, %v728_v27  ;;  %v810_v40 = vrot.slane %v781_v3, 4  ;;  %v741_v9 = vsel %vm290_vm0, %v2909_v14, %v740_v21 }
 0x1f4   :  { %v469_v18 = vperm.slane %v463_v55, %v3095_v59  ;;  %v732_v29 = vrot.slane %v3471_v48, 4  ;;  %v689_v12 = vsel %vm290_vm0, %v3386_v26, %v688_v51  ;;  %v765_v14 = vsel %vm290_vm0, %v3166_v44, %v764_v8 }
 0x1f5   :  { %2175 = vrot.lane.b32.xlu0 %v723_v4, %s2859_s24  ;;  %v752_v4 = vrot.slane %v2999_v61, 4  ;;  %v745_v61 = vperm.slane %v739_v19, %v3066_v53  ;;  %v734_v37 = vrot.slane %v3487_v28, 4  ;;  %v811_v26 = vsel %vm290_vm0, %v810_v40, %v769_v39 }
 0x1f6   :  { %v507_v38 = vsel %vm290_vm0, %v506_v2, %v469_v18  ;;  %v733_v21 = vsel %vm290_vm0, %v3484_v49, %v732_v29  ;;  %v813_v44 = vsel %vm290_vm0, %v781_v3, %v812_v13  ;;  %v886_v27 = vrot.slane %v3209_v43, 4 }
 0x1f7   :  { %2123 = vrot.lane.b32.xlu2 %v505_v11, %s2860_s25  ;;  %v753_v58 = vsel %vm290_vm0, %v2997_v60, %v752_v4  ;;  %v488_v11 = vrot.slane %v3423_v63, 4  ;;  %v787_v19 = vsel %vm290_vm0, %v786_v6, %v745_v61  ;;  %v850_v60 = vrot.slane %v2913_v16, 4 }
 0x1f8   :  { %v822_v63 = vrot.slane %v3491_v36, 4  ;;  %v3521_v51 = vperm.slane %v689_v12, %v3095_v59  ;;  %v3524_v4 = vperm.slane %v787_v19, %v3095_v59  ;;  %v749_v6 = vperm.slane %v741_v9, %v3066_v53 }
 0x1f9   :  { %2183 = vrot.lane.b32.xlu1 %v727_v31, %s2861_s26  ;;  %v3502_v31 = vpop.trf.xlu2  ;;  %v761_v55 = vperm.slane %v753_v58, %v3066_v53  ;;  %v3536_v39 = vperm.slane %v811_v26, %v3095_v59  ;;  %v3539_v40 = vperm.slane %v813_v44, %v3095_v59  ;;  %v489_v13 = vsel %vm290_vm0, %v3376_v33, %v488_v11 }
 0x1fa   :  { %5204 = vst [vmem:[#allocation75_spill] sm:$0xff] %v3524_v4  ;;  %v735_v3 = vsel %vm290_vm0, %v734_v37, %v3521_v51  ;;  %v788_v9 = vrot.slane %v745_v61, 4  ;;  %v851_v29 = vsel %vm290_vm0, %v850_v60, %v2915_v17  ;;  %v852_v58 = vrot.slane %v2915_v17, 4  ;;  %v5208_v61 = vld [vmem:[#allocation36_spill] sm:$0xff] }
 0x1fb   :  { %v3475_v42 = vpop.trf.xlu1  ;;  %v3477_v24 = vpop.trf.xlu0  ;;  %5207 = vst [vmem:[#allocation78_spill] sm:$0xff] %v3536_v39  ;;  %v887_v19 = vsel %vm290_vm0, %v886_v27, %v3064_v25  ;;  %v798_v33 = vrot.slane %v761_v55, 4  ;;  %v862_v11 = vrot.slane %v5208_v61, 4  ;;  %v3556_v17 = vperm.slane %v489_v13, %v3095_v59 }
 0x1fc   :  { %5203 = vst [vmem:[#allocation74_spill] sm:$0xff] %v3477_v24  ;;  %v789_v37 = vsel %vm290_vm0, %v3449_v1, %v788_v9  ;;  %v464_v44 = vrot.slane %v3404_v5, 4  ;;  %v800_v27 = vrot.slane %v749_v6, 4  ;;  %v3573_v13 = vperm.slane %v851_v29, %v3066_v53  ;;  %v5210_v9 = vld [vmem:[#allocation24_spill] sm:$0xff] }
 0x1fd   :  { %2187 = vrot.lane.b32.xlu0 %v729_v15, %s2862_s27  ;;  %v773_v15 = vperm.slane %v765_v14, %v3066_v53  ;;  %v874_v14 = vrot.slane %v3211_v46, 4  ;;  %v3578_v5 = vperm.slane %v789_v37, %v3095_v59  ;;  %v799_v29 = vsel %vm290_vm0, %v798_v33, %v749_v6 }
 0x1fe   :  { %v510_v37 = vrot.slane %v3556_v17, 4  ;;  %v805_v0 = vperm.slane %v799_v29, %v3095_v59 }
 0x1ff   :  { %2127 = vrot.lane.b32.xlu2 %v507_v38, %s2863_s28  ;;  %v823_v12 = vsel %vm290_vm0, %v822_v63, %v773_v15  ;;  %v508_v38 = vrot.slane %v469_v18, 4  ;;  %v838_v18 = vrot.slane %v3539_v40, 4 }
 0x200   :  { %v829_v60 = vperm.slane %v823_v12, %v3095_v59  ;;  %v875_v12 = vsel %vm290_vm0, %v874_v14, %v5210_v9 }
 0x201   :  { %2195 = vrot.lane.b32.xlu1 %v733_v21, %s5104_s29  ;;  %v836_v21 = vrot.slane %v3524_v4, 4  ;;  %v509_v63 = vsel %vm290_vm0, %v3458_v35, %v508_v38  ;;  %v3567_v1 = vpop.trf.xlu2  ;;  %v853_v35 = vsel %vm290_vm0, %v2913_v16, %v852_v58  ;;  %v465_v16 = vsel %vm290_vm0, %v3419_v54, %v464_v44  ;;  %v5214_v44 = vld [vmem:[#allocation8_spill] sm:$0xff] }
 0x202   :  { %5209 = vst [vmem:[#allocation36_spill] sm:$0xff] %v3567_v1  ;;  %v824_v58 = vrot.slane %v773_v15, 4  ;;  %v839_v14 = vsel %vm290_vm0, %v838_v18, %v3578_v5  ;;  %v842_v4 = vrot.slane %v829_v60, 4  ;;  %v801_v54 = vsel %vm290_vm0, %v761_v55, %v800_v27 }
 0x203   :  { %v3529_v2 = vpop.trf.xlu1  ;;  %v3531_v8 = vpop.trf.xlu0  ;;  %v837_v26 = vsel %vm290_vm0, %v3536_v39, %v836_v21  ;;  %v3599_v6 = vperm.slane %v853_v35, %v3066_v53  ;;  %v900_v15 = vrot.slane %v3573_v13, 4  ;;  %v876_v55 = vrot.slane %v5210_v9, 4 }
 0x204   :  { %5205 = vst [vmem:[#allocation76_spill] sm:$0xff] %v3529_v2  ;;  %v825_v29 = vsel %vm290_vm0, %v3491_v36, %v824_v58  ;;  %v1784_v36 = vrot.slane %v3440_v56, 4  ;;  %v5215_v58 = vld [vmem:[#allocation38_spill] sm:$0xff]  ;;  %v5220_v56 = vld [vmem:[#allocation39_spill] sm:$0xff] }
 0x205   :  { %5206 = vst [vmem:[#allocation77_spill] sm:$0xff] %v3531_v8  ;;  %2199 = vrot.lane.b32.xlu0 %v735_v3, %s2865_s30  ;;  %v893_v3 = vperm.slane %v887_v19, %v3066_v53  ;;  %v5211_v19 = vld [vmem:[#allocation37_spill] sm:$0xff] }
 0x206   :  { %v863_v38 = vsel %vm290_vm0, %v862_v11, %v5211_v19  ;;  %v864_v21 = vrot.slane %v5211_v19, 4  ;;  %v881_v11 = vperm.slane %v875_v12, %v3066_v53  ;;  %v473_v19 = vperm.slane %v465_v16, %v3095_v59 }
 0x207   :  { %2131 = vrot.lane.b32.xlu2 %v509_v63, %s2866_s2  ;;  %v922_v39 = vrot.slane %v893_v3, 4  ;;  %v869_v18 = vperm.slane %v863_v38, %v3066_v53  ;;  %v962_v12 = vrot.slane %v5214_v44, 4  ;;  %v843_v16 = vsel %vm290_vm0, %v842_v4, %v805_v0 }
 0x208   :  { %v865_v33 = vsel %vm290_vm0, %v5208_v61, %v864_v21  ;;  %v924_v27 = vrot.slane %v881_v11, 4  ;;  %v3614_v61 = vperm.slane %v801_v54, %v3095_v59  ;;  %v888_v4 = vrot.slane %v3064_v25, 4 }
 0x209   :  { %2207 = vrot.lane.b32.xlu1 %v837_v26, %s2844_s12  ;;  %v923_v35 = vsel %vm290_vm0, %v922_v39, %v881_v11  ;;  %v3618_v38 = vperm.slane %v865_v33, %v3066_v53  ;;  %v844_v21 = vrot.slane %v805_v0, 4  ;;  %v898_v9 = vrot.slane %v869_v18, 4 }
 0x20a   :  { %v3628_v54 = vperm.slane %v825_v29, %v3095_v59  ;;  %v889_v39 = vsel %vm290_vm0, %v3209_v43, %v888_v4  ;;  %v3638_v33 = vperm.slane %v923_v35, %v3095_v59  ;;  %v848_v29 = vrot.slane %v3614_v61, 4 }
 0x20b   :  { %v3583_v63 = vpop.trf.xlu1  ;;  %v3585_v26 = vpop.trf.xlu0  ;;  %v845_v0 = vsel %vm290_vm0, %v829_v60, %v844_v21  ;;  %v925_v43 = vsel %vm290_vm0, %v893_v3, %v924_v27  ;;  %v910_v4 = vrot.slane %v3618_v38, 4  ;;  %v998_v60 = vrot.slane %v3263_v45, 4 }
 0x20c   :  { %5212 = vst [vmem:[#allocation24_spill] sm:$0xff] %v3583_v63  ;;  %v897_v21 = vperm.slane %v889_v39, %v3066_v53  ;;  %v849_v3 = vsel %vm290_vm0, %v3628_v54, %v848_v29  ;;  %v946_v27 = vrot.slane %v3638_v33, 4  ;;  %v974_v39 = vrot.slane %v5220_v56, 4 }
 0x20d   :  { %5213 = vst [vmem:[#allocation37_spill] sm:$0xff] %v3585_v26  ;;  %2211 = vrot.lane.b32.xlu0 %v839_v14, %s2856_s21  ;;  %v511_v14 = vsel %vm290_vm0, %v510_v37, %v473_v19  ;;  %v1772_v37 = vrot.slane %v5215_v58, 4 }
 0x20e   :  { %5218 = vst [vmem:[#allocation80_spill] sm:$0xff] %v3638_v33 }
 0x20f   :  { %2135 = vrot.lane.b32.xlu2 %v511_v14, %s2867_s3 }
 0x211   :  { %2219 = vrot.lane.b32.xlu1 %v843_v16, %s2847_s0  ;;  %v3623_v63 = vpop.permute.xlu2 %2083  ;;  %v512_v16 = vrot.slane %v473_v19, 4 }
 0x213   :  { %v3625_v14 = vpop.trf.xlu1  ;;  %v3634_v11 = vpop.trf.xlu0 }
 0x214   :  { %5216 = vst [vmem:[#allocation8_spill] sm:$0xff] %v3625_v14  ;;  %v1785_v25 = vsel %vm290_vm0, %v3625_v14, %v1784_v36  ;;  %v1773_v19 = vsel %vm290_vm0, %v3634_v11, %v1772_v37  ;;  %v877_v36 = vsel %vm290_vm0, %v3211_v46, %v876_v55  ;;  %v513_v37 = vsel %vm290_vm0, %v3556_v17, %v512_v16  ;;  %v5219_v55 = vld [vmem:[#allocation9_spill] sm:$0xff] }
 0x215   :  { %5217 = vst [vmem:[#allocation79_spill] sm:$0xff] %v3634_v11  ;;  %v1793_v58 = vperm.slane %v1785_v25, %v3066_v53  ;;  %2223 = vrot.lane.b32.xlu0 %v845_v0, %s2848_s13  ;;  %v1781_v35 = vperm.slane %v1773_v19, %v3066_v53  ;;  %v899_v0 = vsel %vm290_vm0, %v898_v9, %v3573_v13  ;;  %v5222_v13 = vld [vmem:[#allocation61_spill] sm:$0xff]  ;;  %v1896_v16 = vrot.slane %v3502_v31, 4 }
 0x216   :  { %v933_v46 = vperm.slane %v925_v43, %v3095_v59  ;;  %v963_v19 = vsel %vm290_vm0, %v962_v12, %v5219_v55  ;;  %v885_v14 = vperm.slane %v877_v36, %v3066_v53  ;;  %v999_v9 = vsel %vm290_vm0, %v998_v60, %v5222_v13  ;;  %v5225_v43 = vld [vmem:[#allocation41_spill] sm:$0xff] }
 0x217   :  { %v1830_v25 = vrot.slane %v1793_v58, 4  ;;  %v1832_v11 = vrot.slane %v1781_v35, 4  ;;  %2139 = vrot.lane.b32.xlu2 %v513_v37, %s2868_s4  ;;  %v3676_v12 = vperm.slane %v899_v0, %v3095_v59  ;;  %v1884_v36 = vrot.slane %v5225_v43, 4 }
 0x218   :  { %v901_v37 = vsel %vm290_vm0, %v869_v18, %v900_v15  ;;  %v986_v60 = vrot.slane %v3265_v47, 4  ;;  %v950_v0 = vrot.slane %v933_v46, 4  ;;  %v3689_v8 = vperm.slane %v999_v9, %v3066_v53 }
 0x219   :  { %v3665_v17 = vsel %vm290_vm0, %v1830_v25, %v1781_v35  ;;  %2231 = vrot.lane.b32.xlu1 %v849_v3, %s2850_s15  ;;  %v3673_v29 = vsel %vm290_vm0, %v1793_v58, %v1832_v11  ;;  %5224 = vst [vmem:[#allocation61_spill] sm:$0xff] %v3676_v12  ;;  %v934_v35 = vrot.slane %v897_v21, 4  ;;  %v3679_v25 = vpop.permute.xlu2 %2095  ;;  %v911_v3 = vsel %vm290_vm0, %v910_v4, %v3599_v6 }
 0x21a   :  { %5221 = vst [vmem:[#allocation9_spill] sm:$0xff] %v3665_v17  ;;  %v947_v11 = vsel %vm290_vm0, %v946_v27, %v3676_v12  ;;  %v912_v18 = vrot.slane %v3599_v6, 4  ;;  %v3698_v4 = vperm.slane %v963_v19, %v3066_v53  ;;  %v909_v33 = vperm.slane %v901_v37, %v3095_v59 }
 0x21b   :  { %5223 = vst [vmem:[#allocation39_spill] sm:$0xff] %v3673_v29  ;;  %v287_v17 = vpop.trf.xlu1  ;;  %v255_v58 = vpop.trf.xlu0  ;;  %v936_v29 = vrot.slane %v885_v14, 4  ;;  %v3711_v19 = vperm.slane %v911_v3, %v3095_v59  ;;  %v935_v37 = vsel %vm290_vm0, %v934_v35, %v885_v14 }
 0x21c   :  { %v1897_v26 = vsel %vm290_vm0, %v287_v17, %v1896_v16  ;;  %v1885_v15 = vsel %vm290_vm0, %v255_v58, %v1884_v36  ;;  %v5227_v16 = vld [vmem:[#allocation40_spill] sm:$0xff]  ;;  %v1894_v12 = vrot.slane %v287_v17, 4  ;;  %v1882_v24 = vrot.slane %v255_v58, 4  ;;  %v5229_v36 = vld [vmem:[#allocation27_spill] sm:$0xff] }
 0x21d   :  { %v3692_v2 = vperm.slane %v1897_v26, %v3066_v53  ;;  %2235 = vrot.lane.b32.xlu0 %v947_v11, %s2852_s17  ;;  %v975_v27 = vsel %vm290_vm0, %v974_v39, %v5227_v16  ;;  %v3705_v26 = vperm.slane %v1885_v15, %v3066_v53  ;;  %v987_v11 = vsel %vm290_vm0, %v986_v60, %v5229_v36  ;;  %v5231_v60 = vld [vmem:[#allocation44_spill] sm:$0xff] }
 0x21e   :  { %v951_v6 = vsel %vm290_vm0, %v950_v0, %v909_v33  ;;  %v913_v39 = vsel %vm290_vm0, %v3618_v38, %v912_v18  ;;  %v937_v17 = vsel %vm290_vm0, %v897_v21, %v936_v29  ;;  %v1034_v58 = vrot.slane %v3689_v8, 4 }
 0x21f   :  { %5226 = vst [vmem:[#allocation41_spill] sm:$0xff] %v3692_v2  ;;  %v1942_v9 = vrot.slane %v3692_v2, 4  ;;  %2143 = vrot.lane.b32.xlu2 %v3257_v10, %s2843_s11  ;;  %v981_v3 = vperm.slane %v975_v27, %v3066_v53  ;;  %v1996_v0 = vrot.slane %v5231_v60, 4  ;;  %v2008_v38 = vrot.slane %v3567_v1, 4 }
 0x220   :  { %5228 = vst [vmem:[#allocation40_spill] sm:$0xff] %v3705_v26  ;;  %v952_v14 = vrot.slane %v909_v33, 4  ;;  %v1000_v21 = vrot.slane %v5222_v13, 4  ;;  %v3730_v29 = vperm.slane %v987_v11, %v3066_v53  ;;  %v1895_v35 = vsel %vm290_vm0, %v1894_v12, %v3502_v31 }
 0x221   :  { %v3720_v15 = vsel %vm290_vm0, %v1942_v9, %v3705_v26  ;;  %2243 = vrot.lane.b32.xlu1 %v951_v6, %s2857_s22  ;;  %v1883_v10 = vsel %vm290_vm0, %v1882_v24, %v5225_v43  ;;  %v3736_v18 = vpop.permute.xlu2 %2099  ;;  %v3746_v13 = vperm.slane %v935_v37, %v3095_v59  ;;  %v3749_v11 = vperm.slane %v937_v17, %v3095_v59 }
 0x222   :  { %5230 = vst [vmem:[#allocation27_spill] sm:$0xff] %v3720_v15  ;;  %v953_v33 = vsel %vm290_vm0, %v933_v46, %v952_v14  ;;  %v956_v12 = vrot.slane %v3711_v19, 4  ;;  %v1035_v43 = vsel %vm290_vm0, %v1034_v58, %v3730_v29  ;;  %v1001_v46 = vsel %vm290_vm0, %v3263_v45, %v1000_v21 }
 0x223   :  { %v3738_v9 = vpop.trf.xlu1  ;;  %v3742_v6 = vpop.trf.xlu0  ;;  %v1901_v37 = vperm.slane %v1895_v35, %v3066_v53  ;;  %v1889_v17 = vperm.slane %v1883_v10, %v3066_v53  ;;  %v988_v14 = vrot.slane %v5229_v36, 4  ;;  %v958_v58 = vrot.slane %v3749_v11, 4 }
 0x224   :  { %5232 = vst [vmem:[#allocation81_spill] sm:$0xff] %v3738_v9  ;;  %v2009_v27 = vsel %vm290_vm0, %v3738_v9, %v2008_v38  ;;  %v1997_v24 = vsel %vm290_vm0, %v3742_v6, %v1996_v0  ;;  %v976_v0 = vrot.slane %v5227_v16, 4  ;;  %v957_v2 = vsel %vm290_vm0, %v3746_v13, %v956_v12 }
 0x225   :  { %5233 = vst [vmem:[#allocation82_spill] sm:$0xff] %v3742_v6  ;;  %v2017_v31 = vperm.slane %v2009_v27, %v3066_v53  ;;  %2247 = vrot.lane.b32.xlu0 %v953_v33, %s2860_s25  ;;  %v2005_v38 = vperm.slane %v1997_v24, %v3066_v53  ;;  %v1010_v27 = vrot.slane %v981_v3, 4  ;;  %v1041_v45 = vperm.slane %v1035_v43, %v3095_v59 }
 0x226   :  { %v1009_v21 = vperm.slane %v1001_v46, %v3066_v53  ;;  %v3777_v16 = vperm.slane %v913_v39, %v3095_v59  ;;  %v989_v36 = vsel %vm290_vm0, %v3265_v47, %v988_v14  ;;  %v1930_v10 = vrot.slane %v1901_v37, 4 }
 0x227   :  { %v2054_v33 = vrot.slane %v2017_v31, 4  ;;  %v2056_v15 = vrot.slane %v2005_v38, 4  ;;  %2147 = vrot.lane.b32.xlu2 %v3260_v30, %s2869_s5  ;;  %v1932_v24 = vrot.slane %v1889_v17, 4  ;;  %v964_v43 = vrot.slane %v5219_v55, 4 }
 0x228   :  { %v1011_v30 = vsel %vm290_vm0, %v1010_v27, %v3698_v4  ;;  %v959_v39 = vsel %vm290_vm0, %v958_v58, %v3777_v16  ;;  %v614_v47 = vrot.slane %v3273_v62, 4  ;;  %v1012_v14 = vrot.slane %v3698_v4, 4  ;;  %v5238_v4 = vld [vmem:[#allocation42_spill] sm:$0xff] }
 0x229   :  { %v3771_v35 = vsel %vm290_vm0, %v2054_v33, %v2005_v38  ;;  %2255 = vrot.lane.b32.xlu1 %v957_v2, %s2866_s2  ;;  %v3782_v12 = vsel %vm290_vm0, %v2017_v31, %v2056_v15  ;;  %v3785_v46 = vpop.permute.xlu2 %2103  ;;  %v977_v2 = vsel %vm290_vm0, %v5220_v56, %v976_v0  ;;  %v1058_v38 = vrot.slane %v1041_v45, 4 }
 0x22a   :  { %5234 = vst [vmem:[#allocation83_spill] sm:$0xff] %v3771_v35  ;;  %v1046_v15 = vrot.slane %v1009_v21, 4  ;;  %v997_v31 = vperm.slane %v989_v36, %v3066_v53  ;;  %v1036_v55 = vrot.slane %v3730_v29, 4  ;;  %v1017_v27 = vperm.slane %v1011_v30, %v3095_v59 }
 0x22b   :  { %5235 = vst [vmem:[#allocation84_spill] sm:$0xff] %v3782_v12  ;;  %v3800_v33 = vsel %vm290_vm0, %v1930_v10, %v1889_v17  ;;  %v3803_v56 = vsel %vm290_vm0, %v1901_v37, %v1932_v24  ;;  %v985_v62 = vperm.slane %v977_v2, %v3066_v53  ;;  %v1013_v0 = vsel %vm290_vm0, %v981_v3, %v1012_v14  ;;  %v5239_v12 = vld [vmem:[#allocation68_spill] sm:$0xff]  ;;  %v5240_v37 = vld [vmem:[#allocation70_spill] sm:$0xff]  ;;  %v5241_v2 = vld [vmem:[#allocation71_spill] sm:$0xff] }
 0x22c   :  { %5236 = vst [vmem:[#allocation85_spill] sm:$0xff] %v3800_v33  ;;  %v1086_v58 = vrot.slane %v5238_v4, 4  ;;  %v615_v36 = vsel %vm290_vm0, %v614_v47, %v5239_v12  ;;  %v1059_v29 = vsel %vm290_vm0, %v1058_v38, %v1017_v27  ;;  %v965_v30 = vsel %vm290_vm0, %v5214_v44, %v964_v43  ;;  %v5242_v43 = vld [vmem:[#allocation43_spill] sm:$0xff] }
 0x22d   :  { %2259 = vrot.lane.b32.xlu0 %v959_v39, %s2867_s3  ;;  %5237 = vst [vmem:[#allocation86_spill] sm:$0xff] %v3803_v56  ;;  %v1047_v17 = vsel %vm290_vm0, %v1046_v15, %v997_v31  ;;  %v1048_v10 = vrot.slane %v997_v31, 4  ;;  %v1037_v3 = vsel %vm290_vm0, %v3689_v8, %v1036_v55  ;;  %v1110_v24 = vrot.slane %v5240_v37, 4 }
 0x22e   :  { %v1098_v12 = vrot.slane %v5241_v2, 4  ;;  %v1060_v39 = vrot.slane %v1017_v27, 4  ;;  %v3821_v47 = vperm.slane %v1013_v0, %v3095_v59  ;;  %v1022_v44 = vrot.slane %v985_v62, 4 }
 0x22f   :  { %2151 = vrot.lane.b32.xlu2 %v615_v36, %s2870_s6  ;;  %v1087_v38 = vsel %vm290_vm0, %v1086_v58, %v5242_v43  ;;  %v3828_v15 = vperm.slane %v1047_v17, %v3095_v59  ;;  %v618_v8 = vrot.slane %v3316_v32, 4  ;;  %v3833_v55 = vperm.slane %v1037_v3, %v3095_v59  ;;  %v5243_v36 = vld [vmem:[#allocation10_spill] sm:$0xff] }
 0x230   :  { %v1061_v31 = vsel %vm290_vm0, %v1041_v45, %v1060_v39  ;;  %v973_v27 = vperm.slane %v965_v30, %v3066_v53  ;;  %v1049_v0 = vsel %vm290_vm0, %v1009_v21, %v1048_v10  ;;  %v1074_v58 = vrot.slane %v5243_v36, 4  ;;  %v5245_v17 = vld [vmem:[#allocation30_spill] sm:$0xff] }
 0x231   :  { %2267 = vrot.lane.b32.xlu1 %v1059_v29, %s2843_s11  ;;  %v3825_v14 = vpop.permute.xlu2 %2107  ;;  %v5244_v29 = vld [vmem:[#allocation64_spill] sm:$0xff]  ;;  %v1099_v56 = vsel %vm290_vm0, %v1098_v12, %v5245_v17  ;;  %v1064_v45 = vrot.slane %v3821_v47, 4  ;;  %v3845_v32 = vperm.slane %v1087_v38, %v3066_v53  ;;  %v619_v21 = vsel %vm290_vm0, %v618_v8, %v3300_v41 }
 0x232   :  { %v1111_v35 = vsel %vm290_vm0, %v1110_v24, %v5244_v29  ;;  %v1112_v3 = vrot.slane %v5244_v29, 4  ;;  %v1023_v30 = vsel %vm290_vm0, %v1022_v44, %v973_v27  ;;  %v1066_v24 = vrot.slane %v3828_v15, 4  ;;  %v5246_v44 = vld [vmem:[#allocation11_spill] sm:$0xff] }
 0x233   :  { %v1065_v10 = vsel %vm290_vm0, %v3833_v55, %v1064_v45  ;;  %v1057_v39 = vperm.slane %v1049_v0, %v3095_v59  ;;  %v1024_v12 = vrot.slane %v973_v27, 4  ;;  %v1105_v38 = vperm.slane %v1099_v56, %v3066_v53 }
 0x234   :  { %v1075_v41 = vsel %vm290_vm0, %v1074_v58, %v5246_v44  ;;  %v1113_v8 = vsel %vm290_vm0, %v5240_v37, %v1112_v3  ;;  %v3864_v29 = vperm.slane %v1023_v30, %v3095_v59  ;;  %v1122_v27 = vrot.slane %v3845_v32, 4 }
 0x235   :  { %2271 = vrot.lane.b32.xlu0 %v1061_v31, %s2869_s5  ;;  %v1117_v31 = vperm.slane %v1111_v35, %v3066_v53  ;;  %v1025_v35 = vsel %vm290_vm0, %v985_v62, %v1024_v12  ;;  %v1088_v56 = vrot.slane %v5242_v43, 4  ;;  %v1070_v58 = vrot.slane %v1057_v39, 4 }
 0x236   :  { %v1067_v45 = vsel %vm290_vm0, %v1066_v24, %v3864_v29  ;;  %v3876_v37 = vperm.slane %v1113_v8, %v3066_v53  ;;  %v1148_v30 = vrot.slane %v1105_v38, 4  ;;  %v1100_v33 = vrot.slane %v5245_v17, 4 }
 0x237   :  { %2159 = vrot.lane.b32.xlu2 %v619_v21, %s2871_s7  ;;  %v622_v21 = vrot.slane %v3370_v23, 4  ;;  %v1146_v3 = vrot.slane %v1117_v31, 4  ;;  %v1033_v62 = vperm.slane %v1025_v35, %v3095_v59  ;;  %v1076_v43 = vrot.slane %v5246_v44, 4 }
 0x238   :  { %v1089_v23 = vsel %vm290_vm0, %v5238_v4, %v1088_v56  ;;  %v1101_v12 = vsel %vm290_vm0, %v5241_v2, %v1100_v33  ;;  %v1149_v44 = vsel %vm290_vm0, %v1117_v31, %v1148_v30  ;;  %v5248_v30 = vld [vmem:[#allocation12_spill] sm:$0xff] }
 0x239   :  { %2279 = vrot.lane.b32.xlu1 %v1065_v10, %s2853_s18  ;;  %v3867_v0 = vpop.permute.xlu2 %2111  ;;  %v1081_v10 = vperm.slane %v1075_v41, %v3066_v53  ;;  %v623_v41 = vsel %vm290_vm0, %v622_v21, %v3355_v20  ;;  %v1071_v8 = vsel %vm290_vm0, %v1070_v58, %v1033_v62  ;;  %v1147_v17 = vsel %vm290_vm0, %v1146_v3, %v1105_v38  ;;  %v5247_v20 = vld [vmem:[#allocation45_spill] sm:$0xff] }
 0x23a   :  { %v1072_v4 = vrot.slane %v1033_v62, 4  ;;  %v1097_v33 = vperm.slane %v1089_v23, %v3066_v53  ;;  %v1198_v2 = vrot.slane %v5247_v20, 4  ;;  %v3901_v35 = vperm.slane %v1101_v12, %v3066_v53  ;;  %v5249_v23 = vld [vmem:[#allocation13_spill] sm:$0xff] }
 0x23b   :  { %v1123_v24 = vsel %vm290_vm0, %v1122_v27, %v1081_v10  ;;  %v1077_v21 = vsel %vm290_vm0, %v5243_v36, %v1076_v43  ;;  %v3909_v31 = vperm.slane %v1147_v17, %v3095_v59  ;;  %v3912_v58 = vperm.slane %v1149_v44, %v3095_v59  ;;  %v5250_v17 = vld [vmem:[#allocation46_spill] sm:$0xff] }
 0x23c   :  { %v3896_v27 = vperm.slane %v1123_v24, %v3095_v59  ;;  %v1073_v38 = vsel %vm290_vm0, %v1057_v39, %v1072_v4  ;;  %v1124_v3 = vrot.slane %v1081_v10, 4  ;;  %v1186_v62 = vrot.slane %v5248_v30, 4 }
 0x23d   :  { %2283 = vrot.lane.b32.xlu0 %v1067_v45, %s2871_s7  ;;  %v1158_v45 = vrot.slane %v3876_v37, 4  ;;  %v1188_v12 = vrot.slane %v5249_v23, 4  ;;  %v1222_v36 = vrot.slane %v3361_v7, 4  ;;  %v724_v39 = vrot.slane %v3416_v34, 4 }
 0x23e   :  { %v1172_v43 = vrot.slane %v3896_v27, 4  ;;  %v1199_v10 = vsel %vm290_vm0, %v1198_v2, %v5250_v17  ;;  %v1125_v44 = vsel %vm290_vm0, %v3845_v32, %v1124_v3  ;;  %v1174_v34 = vrot.slane %v3912_v58, 4  ;;  %v5251_v2 = vld [vmem:[#allocation65_spill] sm:$0xff] }
 0x23f   :  { %2167 = vrot.lane.b32.xlu2 %v623_v41, %s2872_s8  ;;  %v1159_v24 = vsel %vm290_vm0, %v1158_v45, %v3901_v35  ;;  %v1085_v41 = vperm.slane %v1077_v21, %v3066_v53  ;;  %v725_v4 = vsel %vm290_vm0, %v3373_v57, %v724_v39  ;;  %v1187_v21 = vsel %vm290_vm0, %v1186_v62, %v5249_v23 }
 0x240   :  { %v1165_v45 = vperm.slane %v1159_v24, %v3095_v59  ;;  %v1189_v32 = vsel %vm290_vm0, %v5248_v30, %v1188_v12  ;;  %v1223_v3 = vsel %vm290_vm0, %v1222_v36, %v5251_v2  ;;  %v1210_v57 = vrot.slane %v3363_v52, 4 }
 0x241   :  { %2291 = vrot.lane.b32.xlu1 %v1071_v8, %s2872_s8  ;;  %v3903_v56 = vpop.permute.xlu2 %2115  ;;  %v1134_v8 = vrot.slane %v1097_v33, 4  ;;  %v3943_v24 = vperm.slane %v1125_v44, %v3095_v59  ;;  %v1200_v39 = vrot.slane %v5250_v17, 4  ;;  %v1205_v62 = vperm.slane %v1199_v10, %v3066_v53 }
 0x242   :  { %v1224_v23 = vrot.slane %v5251_v2, 4  ;;  %v1136_v12 = vrot.slane %v1085_v41, 4  ;;  %v1178_v44 = vrot.slane %v1165_v45, 4  ;;  %v1193_v60 = vperm.slane %v1187_v21, %v3066_v53 }
 0x243   :  { %v1135_v30 = vsel %vm290_vm0, %v1134_v8, %v1085_v41  ;;  %v1175_v36 = vsel %vm290_vm0, %v1174_v34, %v3943_v24  ;;  %v1160_v17 = vrot.slane %v3901_v35, 4  ;;  %v1229_v2 = vperm.slane %v1223_v3, %v3066_v53  ;;  %v5252_v41 = vld [vmem:[#allocation31_spill] sm:$0xff] }
 0x244   :  { %v1225_v10 = vsel %vm290_vm0, %v3361_v7, %v1224_v23  ;;  %v3963_v8 = vperm.slane %v1189_v32, %v3066_v53  ;;  %v1211_v34 = vsel %vm290_vm0, %v1210_v57, %v5252_v41  ;;  %v1212_v1 = vrot.slane %v5252_v41, 4  ;;  %v5253_v23 = vld [vmem:[#allocation47_spill] sm:$0xff] }
 0x245   :  { %2295 = vrot.lane.b32.xlu0 %v1073_v38, %s2858_s23  ;;  %v1173_v38 = vsel %vm290_vm0, %v3909_v31, %v1172_v43  ;;  %v1201_v35 = vsel %vm290_vm0, %v5247_v20, %v1200_v39  ;;  %v1234_v21 = vrot.slane %v1205_v62, 4  ;;  %v1137_v7 = vsel %vm290_vm0, %v1097_v33, %v1136_v12  ;;  %v5254_v20 = vld [vmem:[#allocation14_spill] sm:$0xff] }
 0x246   :  { %v1310_v3 = vrot.slane %v5253_v23, 4  ;;  %v1236_v26 = vrot.slane %v1193_v60, 4  ;;  %v1217_v41 = vperm.slane %v1211_v34, %v3066_v53  ;;  %v1161_v33 = vsel %vm290_vm0, %v3876_v37, %v1160_v17  ;;  %v5256_v17 = vld [vmem:[#allocation48_spill] sm:$0xff] }
 0x247   :  { %2179 = vrot.lane.b32.xlu2 %v725_v4, %s2873_s9  ;;  %v1298_v39 = vrot.slane %v5254_v20, 4  ;;  %v1213_v12 = vsel %vm290_vm0, %v3363_v52, %v1212_v1  ;;  %v1235_v37 = vsel %vm290_vm0, %v1234_v21, %v1193_v60  ;;  %v5257_v60 = vld [vmem:[#allocation15_spill] sm:$0xff] }
 0x249   :  { %2303 = vrot.lane.b32.xlu1 %v1173_v38, %s2873_s9  ;;  %v3948_v43 = vpop.permute.xlu2 %2119  ;;  %v730_v38 = vrot.slane %v3484_v49, 4  ;;  %v1141_v49 = vperm.slane %v1135_v30, %v3095_v59  ;;  %v1258_v30 = vrot.slane %v1229_v2, 4  ;;  %v1299_v21 = vsel %vm290_vm0, %v1298_v39, %v5257_v60 }
 0x24b   :  { %v3950_v4 = vpop.permute.xlu1 %2091  ;;  %v731_v32 = vsel %vm290_vm0, %v730_v38, %v3471_v48  ;;  %v1179_v57 = vsel %vm290_vm0, %v1178_v44, %v1141_v49  ;;  %v1180_v48 = vrot.slane %v1141_v49, 4  ;;  %v3988_v38 = vperm.slane %v1137_v7, %v3095_v59 }
 0x24c   :  { %v3991_v44 = vperm.slane %v1201_v35, %v3066_v53  ;;  %v4004_v49 = vperm.slane %v1161_v33, %v3095_v59  ;;  %v1259_v7 = vsel %vm290_vm0, %v1258_v30, %v1217_v41  ;;  %v5261_v33 = vld [vmem:[#allocation63_spill] sm:$0xff] }
 0x24d   :  { %2307 = vrot.lane.b32.xlu0 %v1175_v36, %s2861_s26  ;;  %v3974_v36 = vperm.slane %v1225_v10, %v3066_v53  ;;  %5255 = vst [vmem:[#allocation42_spill] sm:$0xff] %v3988_v38  ;;  %v1237_v10 = vsel %vm290_vm0, %v1205_v62, %v1236_v26  ;;  %v1181_v1 = vsel %vm290_vm0, %v1165_v45, %v1180_v48  ;;  %v1260_v62 = vrot.slane %v1217_v41, 4 }
 0x24e   :  { %v1221_v26 = vperm.slane %v1213_v12, %v3066_v53  ;;  %v1184_v6 = vrot.slane %v3988_v38, 4  ;;  %v4015_v45 = vperm.slane %v1235_v37, %v3095_v59  ;;  %v1246_v48 = vrot.slane %v3991_v44, 4  ;;  %v5263_v38 = vld [vmem:[#allocation62_spill] sm:$0xff] }
 0x24f   :  { %2191 = vrot.lane.b32.xlu2 %v731_v32, %s2874_s10  ;;  %v1270_v52 = vrot.slane %v3974_v36, 4  ;;  %v4031_v39 = vperm.slane %v1259_v7, %v3095_v59  ;;  %v4034_v37 = vperm.slane %v1299_v21, %v3066_v53  ;;  %v840_v7 = vrot.slane %v3578_v5, 4 }
 0x250   :  { %5258 = vst [vmem:[#allocation68_spill] sm:$0xff] %v4015_v45  ;;  %v1185_v41 = vsel %vm290_vm0, %v4004_v49, %v1184_v6  ;;  %v1272_v35 = vrot.slane %v1221_v26, 4  ;;  %v1322_v6 = vrot.slane %v3427_v50, 4  ;;  %v1312_v21 = vrot.slane %v5256_v17, 4 }
 0x251   :  { %2315 = vrot.lane.b32.xlu1 %v1179_v57, %s2874_s10  ;;  %v3994_v34 = vpop.permute.xlu2 %2123  ;;  %v1311_v57 = vsel %vm290_vm0, %v1310_v3, %v5256_v17  ;;  %v736_v3 = vrot.slane %v3521_v51, 4  ;;  %v1271_v30 = vsel %vm290_vm0, %v1270_v52, %v1221_v26  ;;  %5260 = vst [vmem:[#allocation71_spill] sm:$0xff] %v4031_v39  ;;  %v1284_v52 = vrot.slane %v4015_v45, 4 }
 0x252   :  { %v4020_v12 = vperm.slane %v1311_v57, %v3066_v53  ;;  %v386_v57 = vrot.slane %v5261_v33, 4  ;;  %v4047_v26 = vperm.slane %v1271_v30, %v3095_v59  ;;  %v1273_v30 = vsel %vm290_vm0, %v3974_v36, %v1272_v35 }
 0x253   :  { %v3996_v32 = vpop.permute.xlu1 %2155  ;;  %v737_v51 = vsel %vm290_vm0, %v3487_v28, %v736_v3  ;;  %v1334_v28 = vrot.slane %v3425_v22, 4 }
 0x254   :  { %v1346_v3 = vrot.slane %v4020_v12, 4  ;;  %v387_v9 = vsel %vm290_vm0, %v386_v57, %v5263_v38  ;;  %v1290_v35 = vrot.slane %v4047_v26, 4 }
 0x255   :  { %2319 = vrot.lane.b32.xlu0 %v1181_v1, %s5104_s29  ;;  %v4023_v1 = vperm.slane %v1237_v10, %v3095_v59  ;;  %s2875_s29 = smov 124   ;;  %v1261_v10 = vsel %vm290_vm0, %v1229_v2, %v1260_v62  ;;  %v1247_v2 = vsel %vm290_vm0, %v1246_v48, %v3963_v8  ;;  %v1285_v62 = vsel %vm290_vm0, %v4031_v39, %v1284_v52  ;;  %v5264_v52 = vld [vmem:[#allocation32_spill] sm:$0xff] }
 0x256   :  { %v4058_v5 = vperm.slane %v1261_v10, %v3095_v59  ;;  %v1323_v10 = vsel %vm290_vm0, %v1322_v6, %v5264_v52  ;;  %v841_v39 = vsel %vm290_vm0, %v3539_v40, %v840_v7  ;;  %v2579_v36 = vsel %vm2578_vm1, %v387_v9, %v3623_v63 }
 0x257   :  { %5259 = vst [vmem:[#allocation70_spill] sm:$0xff] %v4023_v1  ;;  %2203 = vrot.lane.b32.xlu2 %v737_v51, %s2875_s29  ;;  %v1288_v17 = vrot.slane %v4023_v1, 4  ;;  %v1281_v6 = vperm.slane %v1273_v30, %v3095_v59  ;;  %v1329_v7 = vperm.slane %v1323_v10, %v3066_v53  ;;  %v4091_v9 = vperm.slane %v1247_v2, %v3095_v59 }
 0x258   :  { %v1313_v10 = vsel %vm290_vm0, %v5253_v23, %v1312_v21 }
 0x259   :  { %2327 = vrot.lane.b32.xlu1 %v1185_v41, %s2875_s29  ;;  %v4049_v33 = vpop.permute.xlu2 %2127  ;;  %v5262_v41 = vld [vmem:[#allocation66_spill] sm:$0xff]  ;;  %v1372_v30 = vrot.slane %v1329_v7, 4 }
 0x25a   :  { %v1336_v45 = vrot.slane %v5262_v41, 4  ;;  %v1335_v48 = vsel %vm290_vm0, %v1334_v28, %v5262_v41  ;;  %v1289_v28 = vsel %vm290_vm0, %v4058_v5, %v1288_v17 }
 0x25b   :  { %v4051_v51 = vpop.permute.xlu1 %2163  ;;  %v1341_v40 = vperm.slane %v1335_v48, %v3066_v53  ;;  %v1324_v48 = vrot.slane %v5264_v52, 4 }
 0x25c   :  { %v1337_v1 = vsel %vm290_vm0, %v3425_v22, %v1336_v45  ;;  %v5265_v45 = vrot.slane %v3963_v8, 4  ;;  %v1291_v8 = vsel %vm290_vm0, %v1290_v35, %v4091_v9 }
 0x25d   :  { %2331 = vrot.lane.b32.xlu0 %v1285_v62, %s2844_s12  ;;  %v1325_v52 = vsel %vm290_vm0, %v3427_v50, %v1324_v48  ;;  %v1373_v50 = vsel %vm290_vm0, %v1341_v40, %v1372_v30  ;;  %v5270_v30 = vld [vmem:[#allocation61_spill] sm:$0xff] }
 0x25e   :  { %v1249_v62 = vsel %vm290_vm0, %v3991_v44, %v5265_v45  ;;  %v1294_v44 = vrot.slane %v1281_v6, 4 }
 0x25f   :  { %v2088_v38 = vpop.permute.xlu0 %2087  ;;  %2215 = vrot.lane.b32.xlu2 %v841_v39, %s2851_s16  ;;  %v4098_v39 = vperm.slane %v1337_v1, %v3066_v53  ;;  %v1370_v1 = vrot.slane %v1341_v40, 4 }
 0x260   :  { %v2581_v57 = vsel %vm2580_vm2, %v2579_v36, %v2088_v38 }
 0x261   :  { %v2583_v22 = vsel %vm2582_vm3, %v2581_v57, %v3950_v4  ;;  %2339 = vrot.lane.b32.xlu1 %v1289_v28, %s2851_s16  ;;  %v4102_v17 = vpop.permute.xlu2 %2131  ;;  %v1382_v21 = vrot.slane %v4098_v39, 4 }
 0x262   :  { %v2585_v63 = vsel %vm2584_vm4, %v2583_v22, %v3679_v25  ;;  %v846_v25 = vrot.slane %v3628_v54, 4  ;;  %v1333_v22 = vperm.slane %v1325_v52, %v3066_v53 }
 0x263   :  { %v2587_v4 = vsel %vm2586_vm5, %v2585_v63, %v3736_v18  ;;  %v4104_v41 = vpop.permute.xlu1 %2171 }
 0x264   :  { %v2589_v2 = vsel %vm2588_vm6, %v2587_v4, %v3785_v46  ;;  %v1257_v46 = vperm.slane %v1249_v62, %v3095_v59  ;;  %v847_v35 = vsel %vm290_vm0, %v846_v25, %v3614_v61  ;;  %v5267_v62 = vrot.slane %v5257_v60, 4  ;;  %v5271_v60 = vld [vmem:[#allocation49_spill] sm:$0xff] }
 0x265   :  { %v2591_v18 = vsel %vm5135_vm7, %v2589_v2, %v3825_v14  ;;  %2343 = vrot.lane.b32.xlu0 %v1291_v8, %s2847_s0  ;;  %v1347_v14 = vsel %vm290_vm0, %v1346_v3, %v4034_v37  ;;  %v1371_v3 = vsel %vm290_vm0, %v1370_v1, %v1329_v7  ;;  %v1348_v25 = vrot.slane %v4034_v37, 4  ;;  %v5268_v8 = vld [vmem:[#allocation67_spill] sm:$0xff] }
 0x266   :  { %v2593_v54 = vsel %vm5136_vm8, %v2591_v18, %v3867_v0  ;;  %v1295_v23 = vsel %vm290_vm0, %v1294_v44, %v1257_v46  ;;  %v1296_v57 = vrot.slane %v1257_v46, 4  ;;  %v4146_v28 = vperm.slane %v1347_v14, %v3095_v59  ;;  %v5269_v44 = vld [vmem:[#allocation74_spill] sm:$0xff] }
 0x267   :  { %v2595_v36 = vsel %vm5133_vm9, %v2593_v54, %v3903_v56  ;;  %v4122_v38 = vpop.permute.xlu0 %2175  ;;  %2227 = vrot.lane.b32.xlu2 %v847_v35, %s2849_s14  ;;  %v4156_v7 = vperm.slane %v1371_v3, %v3095_v59  ;;  %v1301_v4 = vsel %vm290_vm0, %v5254_v20, %v5267_v62  ;;  %v1383_v2 = vsel %vm290_vm0, %v1382_v21, %v1333_v22  ;;  %v5273_v21 = vld [vmem:[#allocation33_spill] sm:$0xff] }
 0x268   :  { %v2597_v0 = vsel %vm5132_vm10, %v2595_v36, %v3948_v43  ;;  %v1446_v43 = vrot.slane %v3475_v42, 4  ;;  %v1297_v40 = vsel %vm290_vm0, %v1281_v6, %v1296_v57  ;;  %v1434_v1 = vrot.slane %v5269_v44, 4  ;;  %v5272_v36 = vld [vmem:[#allocation80_spill] sm:$0xff]  ;;  %v5274_v57 = vld [vmem:[#allocation50_spill] sm:$0xff] }
 0x269   :  { %v2599_v56 = vsel %vm5118_vm11, %v2597_v0, %v3994_v34  ;;  %2351 = vrot.lane.b32.xlu1 %v1295_v23, %s2849_s14  ;;  %v1321_v34 = vperm.slane %v1313_v10, %v3066_v53  ;;  %v4150_v63 = vpop.permute.xlu2 %2135  ;;  %v948_v18 = vrot.slane %v5270_v30, 4  ;;  %v1396_v48 = vrot.slane %v4146_v28, 4 }
 0x26a   :  { %v4143_v61 = vsel %vm5117_vm12, %v2599_v56, %v4049_v33  ;;  %v4159_v33 = vperm.slane %v1373_v50, %v3095_v59  ;;  %v1447_v6 = vsel %vm290_vm0, %v1446_v43, %v5268_v8  ;;  %v1422_v46 = vrot.slane %v5271_v60, 4 }
 0x26b   :  { %v4152_v45 = vpop.permute.xlu1 %2183  ;;  %v1358_v54 = vrot.slane %v1321_v34, 4  ;;  %v1349_v20 = vsel %vm290_vm0, %v4020_v12, %v1348_v25  ;;  %v1389_v37 = vperm.slane %v1383_v2, %v3095_v59  ;;  %v949_v14 = vsel %vm290_vm0, %v5272_v36, %v948_v18  ;;  %v5275_v18 = vld [vmem:[#allocation16_spill] sm:$0xff] }
 0x26c   :  { %5266 = vst [vmem:[#allocation43_spill] sm:$0xff] %v4159_v33  ;;  %v1397_v52 = vsel %vm290_vm0, %v4156_v7, %v1396_v48  ;;  %v1398_v0 = vrot.slane %v4159_v33, 4  ;;  %v1309_v35 = vperm.slane %v1301_v4, %v3066_v53  ;;  %v1453_v23 = vperm.slane %v1447_v6, %v3066_v53 }
 0x26d   :  { %2355 = vrot.lane.b32.xlu0 %v1297_v40, %s2850_s15  ;;  %v1435_v12 = vsel %vm290_vm0, %v1434_v1, %v5273_v21  ;;  %v4191_v56 = vperm.slane %v1349_v20, %v3095_v59  ;;  %v1423_v40 = vsel %vm290_vm0, %v1422_v46, %v5274_v57  ;;  %v954_v4 = vrot.slane %v3746_v13, 4  ;;  %v5276_v20 = vld [vmem:[#allocation17_spill] sm:$0xff] }
 0x26e   :  { %v1359_v43 = vsel %vm290_vm0, %v1358_v54, %v1309_v35  ;;  %v1402_v25 = vrot.slane %v1389_v37, 4  ;;  %v1360_v2 = vrot.slane %v1309_v35, 4  ;;  %v1384_v6 = vrot.slane %v1333_v22, 4 }
 0x26f   :  { %v4174_v10 = vpop.permute.xlu0 %2187  ;;  %2239 = vrot.lane.b32.xlu2 %v949_v14, %s2854_s19  ;;  %v1399_v62 = vsel %vm290_vm0, %v1398_v0, %v4191_v56  ;;  %v1482_v1 = vrot.slane %v1453_v23, 4  ;;  %v1441_v30 = vperm.slane %v1435_v12, %v3066_v53  ;;  %v1410_v48 = vrot.slane %v5275_v18, 4 }
 0x270   :  { %v1365_v54 = vperm.slane %v1359_v43, %v3095_v59  ;;  %v1412_v36 = vrot.slane %v5276_v20, 4  ;;  %v1424_v46 = vrot.slane %v5274_v57, 4  ;;  %v1429_v14 = vperm.slane %v1423_v40, %v3066_v53 }
 0x271   :  { %2363 = vrot.lane.b32.xlu1 %v1397_v52, %s2854_s19  ;;  %v4193_v3 = vpop.permute.xlu2 %2139  ;;  %v1361_v13 = vsel %vm290_vm0, %v1321_v34, %v1360_v2  ;;  %v955_v22 = vsel %vm290_vm0, %v954_v4, %v3711_v19  ;;  %v1484_v35 = vrot.slane %v1441_v30, 4  ;;  %v1385_v12 = vsel %vm290_vm0, %v4098_v39, %v1384_v6 }
 0x272   :  { %v1403_v0 = vsel %vm290_vm0, %v1402_v25, %v1365_v54  ;;  %v1483_v43 = vsel %vm290_vm0, %v1482_v1, %v1441_v30  ;;  %v1411_v57 = vsel %vm290_vm0, %v1410_v48, %v5276_v20  ;;  %v1448_v34 = vrot.slane %v5268_v8, 4  ;;  %v5280_v48 = vld [vmem:[#allocation18_spill] sm:$0xff] }
 0x273   :  { %v4195_v50 = vpop.permute.xlu1 %2195  ;;  %v1404_v40 = vrot.slane %v1365_v54, 4  ;;  %v4225_v19 = vperm.slane %v1361_v13, %v3095_v59  ;;  %v1436_v4 = vrot.slane %v5273_v21, 4  ;;  %v1425_v25 = vsel %vm290_vm0, %v5271_v60, %v1424_v46 }
 0x274   :  { %v1458_v39 = vrot.slane %v1429_v14, 4  ;;  %v1449_v8 = vsel %vm290_vm0, %v3475_v42, %v1448_v34  ;;  %v4240_v30 = vperm.slane %v1385_v12, %v3095_v59  ;;  %v1417_v21 = vperm.slane %v1411_v57, %v3066_v53 }
 0x275   :  { %2367 = vrot.lane.b32.xlu0 %v1399_v62, %s2857_s22  ;;  %5277 = vst [vmem:[#allocation10_spill] sm:$0xff] %v4225_v19  ;;  %v1413_v62 = vsel %vm290_vm0, %v5275_v18, %v1412_v36  ;;  %v1405_v1 = vsel %vm290_vm0, %v1389_v37, %v1404_v40  ;;  %v4243_v18 = vperm.slane %v1483_v43, %v3095_v59  ;;  %v1522_v60 = vrot.slane %v5280_v48, 4  ;;  %v5281_v36 = vld [vmem:[#allocation76_spill] sm:$0xff] }
 0x276   :  { %5278 = vst [vmem:[#allocation64_spill] sm:$0xff] %v4240_v30  ;;  %v960_v54 = vrot.slane %v3777_v16, 4  ;;  %v1485_v20 = vsel %vm290_vm0, %v1453_v23, %v1484_v35  ;;  %v4251_v42 = vperm.slane %v1425_v25, %v3066_v53  ;;  %v1437_v37 = vsel %vm290_vm0, %v5269_v44, %v1436_v4 }
 0x277   :  { %v4210_v52 = vpop.permute.xlu0 %2199  ;;  %2251 = vrot.lane.b32.xlu2 %v955_v22, %s2863_s28  ;;  %5279 = vst [vmem:[#allocation30_spill] sm:$0xff] %v4243_v18  ;;  %v1558_v46 = vrot.slane %v5281_v36, 4  ;;  %v1408_v13 = vrot.slane %v4225_v19, 4  ;;  %v5282_v22 = vld [vmem:[#allocation19_spill] sm:$0xff]  ;;  %v1457_v12 = vperm.slane %v1449_v8, %v3066_v53  ;;  %v1459_v16 = vsel %vm290_vm0, %v1458_v39, %v1417_v21  ;;  %v5283_v39 = vld [vmem:[#allocation69_spill] sm:$0xff]  ;;  %v5289_v19 = vld [vmem:[#allocation52_spill] sm:$0xff] }
 0x278   :  { %v961_v23 = vsel %vm290_vm0, %v3749_v11, %v960_v54  ;;  %v1506_v44 = vrot.slane %v4243_v18, 4  ;;  %v1493_v57 = vperm.slane %v1485_v20, %v3095_v59  ;;  %v4269_v34 = vperm.slane %v1413_v62, %v3066_v53 }
 0x279   :  { %2375 = vrot.lane.b32.xlu1 %v1403_v0, %s2863_s28  ;;  %v4232_v2 = vpop.permute.xlu2 %2143  ;;  %v1524_v0 = vrot.slane %v5282_v22, 4  ;;  %v1409_v35 = vsel %vm290_vm0, %v4240_v30, %v1408_v13  ;;  %v1460_v40 = vrot.slane %v1417_v21, 4  ;;  %v1445_v4 = vperm.slane %v1437_v37, %v3066_v53  ;;  %v5285_v21 = vld [vmem:[#allocation51_spill] sm:$0xff] }
 0x27a   :  { %v1523_v11 = vsel %vm290_vm0, %v1522_v60, %v5282_v22  ;;  %v1470_v25 = vrot.slane %v4251_v42, 4  ;;  %v1559_v8 = vsel %vm290_vm0, %v1558_v46, %v5283_v39  ;;  %v1534_v54 = vrot.slane %v5285_v21, 4 }
 0x27b   :  { %v4234_v6 = vpop.permute.xlu1 %2207  ;;  %v1525_v62 = vsel %vm290_vm0, %v5280_v48, %v1524_v0  ;;  %v1494_v20 = vrot.slane %v1457_v12, 4  ;;  %v1461_v13 = vsel %vm290_vm0, %v1429_v14, %v1460_v40  ;;  %v1062_v46 = vrot.slane %v3833_v55, 4  ;;  %v5288_v55 = vld [vmem:[#allocation20_spill] sm:$0xff] }
 0x27c   :  { %v4293_v18 = vperm.slane %v1559_v8, %v3066_v53  ;;  %v4299_v0 = vperm.slane %v1523_v11, %v3066_v53  ;;  %v1469_v14 = vperm.slane %v1461_v13, %v3095_v59  ;;  %v1471_v40 = vsel %vm290_vm0, %v1470_v25, %v4269_v34 }
 0x27d   :  { %2379 = vrot.lane.b32.xlu0 %v1405_v1, %s2866_s2  ;;  %v4280_v1 = vperm.slane %v1459_v16, %v3095_v59  ;;  %v1496_v16 = vrot.slane %v1445_v4, 4  ;;  %v1535_v8 = vsel %vm290_vm0, %v1534_v54, %v5289_v19  ;;  %v1495_v30 = vsel %vm290_vm0, %v1494_v20, %v1445_v4 }
 0x27e   :  { %v1063_v11 = vsel %vm290_vm0, %v1062_v46, %v3821_v47  ;;  %v1594_v33 = vrot.slane %v4293_v18, 4  ;;  %v4323_v4 = vperm.slane %v1471_v40, %v3095_v59  ;;  %v1472_v54 = vrot.slane %v4269_v34, 4  ;;  %v5292_v47 = vld [vmem:[#allocation21_spill] sm:$0xff] }
 0x27f   :  { %v4259_v43 = vpop.permute.xlu0 %2211  ;;  %2263 = vrot.lane.b32.xlu2 %v961_v23, %s2868_s4  ;;  %5284 = vst [vmem:[#allocation11_spill] sm:$0xff] %v4280_v1  ;;  %v5286_v23 = vld [vmem:[#allocation77_spill] sm:$0xff]  ;;  %v1507_v22 = vsel %vm290_vm0, %v1506_v44, %v4280_v1  ;;  %v4305_v44 = vperm.slane %v1525_v62, %v3066_v53  ;;  %v1634_v1 = vrot.slane %v5288_v55, 4  ;;  %v1497_v62 = vsel %vm290_vm0, %v1457_v12, %v1496_v16 }
 0x280   :  { %v1546_v60 = vrot.slane %v5286_v23, 4  ;;  %v1572_v20 = vrot.slane %v4299_v0, 4  ;;  %v1512_v46 = vrot.slane %v1469_v14, 4  ;;  %v1541_v12 = vperm.slane %v1535_v8, %v3066_v53 }
 0x281   :  { %2387 = vrot.lane.b32.xlu1 %v1409_v35, %s2868_s4  ;;  %v4285_v37 = vpop.permute.xlu2 %2147  ;;  %v1510_v35 = vrot.slane %v1493_v57, 4  ;;  %v1635_v40 = vsel %vm290_vm0, %v1634_v1, %v5292_v47  ;;  %v1560_v34 = vrot.slane %v5283_v39, 4  ;;  %v1068_v8 = vrot.slane %v3864_v29, 4 }
 0x282   :  { %vm5122_vm12 = vcmask 556032   ;;  %vm5121_vm11 = vcmask 588800  }
 0x283   :  { %v4295_v48 = vpop.permute.xlu1 %2219  ;;  %v1511_v25 = vsel %vm290_vm0, %v1510_v35, %v1469_v14  ;;  %v1584_v35 = vrot.slane %v4305_v44, 4  ;;  %v4341_v14 = vperm.slane %v1497_v62, %v3095_v59  ;;  %v1561_v62 = vsel %vm290_vm0, %v5281_v36, %v1560_v34 }
 0x284   :  { %5287 = vst [vmem:[#allocation45_spill] sm:$0xff] %v4295_v48  ;;  %v5290_v48 = vld [vmem:[#allocation34_spill] sm:$0xff]  ;;  %v1069_v29 = vsel %vm290_vm0, %v3828_v15, %v1068_v8  ;;  %v1170_v8 = vrot.slane %v3909_v31, 4 }
 0x285   :  { %2391 = vrot.lane.b32.xlu0 %v1507_v22, %s2843_s11  ;;  %v1547_v22 = vsel %vm290_vm0, %v1546_v60, %v5290_v48  ;;  %v1636_v60 = vrot.slane %v5292_v47, 4  ;;  %v1548_v39 = vrot.slane %v5290_v48, 4  ;;  %v1570_v47 = vrot.slane %v1541_v12, 4 }
 0x286   :  { %v4331_v16 = vperm.slane %v1547_v22, %v3066_v53  ;;  %v1516_v22 = vrot.slane %v4323_v4, 4  ;;  %v2603_v48 = vsel %vm5116_vm13, %v4143_v61, %v4102_v17  ;;  %vm5120_vm13 = vcmask 523264  }
 0x287   :  { %v4315_v13 = vpop.permute.xlu0 %2223  ;;  %2275 = vrot.lane.b32.xlu2 %v1063_v11, %s2870_s6  ;;  %v1637_v1 = vsel %vm290_vm0, %v5288_v55, %v1636_v60  ;;  %v4368_v55 = vperm.slane %v1635_v40, %v3066_v53  ;;  %v1569_v60 = vperm.slane %v1561_v62, %v3066_v53  ;;  %v1549_v61 = vsel %vm290_vm0, %v5286_v23, %v1548_v39 }
 0x288   :  { %5291 = vst [vmem:[#allocation12_spill] sm:$0xff] %v4315_v13  ;;  %v1513_v13 = vsel %vm290_vm0, %v1493_v57, %v1512_v46  ;;  %v1536_v57 = vrot.slane %v5289_v19, 4  ;;  %v1518_v19 = vrot.slane %v4341_v14, 4  ;;  %v4371_v15 = vperm.slane %v1637_v1, %v3066_v53 }
 0x289   :  { %2399 = vrot.lane.b32.xlu1 %v1511_v25, %s2870_s6  ;;  %v2152_v11 = vpop.permute.xlu2 %2151  ;;  %v4334_v25 = vperm.slane %v1495_v30, %v3095_v59  ;;  %v1595_v30 = vsel %vm290_vm0, %v1594_v33, %v4331_v16  ;;  %v1473_v33 = vsel %vm290_vm0, %v4251_v42, %v1472_v54  ;;  %v2605_v40 = vsel %vm2604_vm14, %v2603_v48, %v4150_v63 }
 0x28a   :  { %v1601_v36 = vperm.slane %v1595_v30, %v3095_v59  ;;  %v1537_v17 = vsel %vm290_vm0, %v5285_v21, %v1536_v57  ;;  %v4383_v54 = vperm.slane %v1473_v33, %v3095_v59  ;;  %v2607_v21 = vsel %vm5119_vm15, %v2605_v40, %v4193_v3  ;;  %v5294_v33 = vld [vmem:[#allocation53_spill] sm:$0xff] }
 0x28b   :  { %v4354_v46 = vpop.permute.xlu1 %2231  ;;  %v1606_v1 = vrot.slane %v1569_v60, 4  ;;  %v1557_v39 = vperm.slane %v1549_v61, %v3066_v53  ;;  %v1596_v63 = vrot.slane %v4331_v16, 4  ;;  %v2609_v57 = vsel %vm5120_vm13, %v2607_v21, %v4232_v2  ;;  %v5295_v61 = vld [vmem:[#allocation54_spill] sm:$0xff] }
 0x28c   :  { %v1519_v23 = vsel %vm290_vm0, %v1518_v19, %v4383_v54  ;;  %v1618_v30 = vrot.slane %v1601_v36, 4  ;;  %v1684_v31 = vrot.slane %v4368_v55, 4  ;;  %v2611_v3 = vsel %vm5122_vm12, %v2609_v57, %v4285_v37 }
 0x28d   :  { %2403 = vrot.lane.b32.xlu0 %v1513_v13, %s2853_s18  ;;  %v1517_v13 = vsel %vm290_vm0, %v4334_v25, %v1516_v22  ;;  %v1571_v22 = vsel %vm290_vm0, %v1570_v47, %v4299_v0  ;;  %v5293_v0 = vld [vmem:[#allocation37_spill] sm:$0xff]  ;;  %v2613_v16 = vsel %vm5121_vm11, %v2611_v3, %v2152_v11  ;;  %vm5134_vm15 = vcmask 621568  }
 0x28e   :  { %v1658_v62 = vrot.slane %v5293_v0, 4  ;;  %v1577_v47 = vperm.slane %v1571_v22, %v3095_v59  ;;  %v1646_v2 = vrot.slane %v5294_v33, 4  ;;  %vm5123_vm13 = vcmask 654336  }
 0x28f   :  { %2287 = vrot.lane.b32.xlu2 %v1069_v29, %s2855_s20  ;;  %v4380_v42 = vpop.permute.xlu0 %2235  ;;  %v1545_v29 = vperm.slane %v1537_v17, %v3066_v53  ;;  %v1171_v48 = vsel %vm290_vm0, %v1170_v8, %v3896_v27  ;;  %v1648_v40 = vrot.slane %v5295_v61, 4  ;;  %v1607_v37 = vsel %vm290_vm0, %v1606_v1, %v1557_v39 }
 0x290   :  { %v1619_v19 = vsel %vm290_vm0, %v1618_v30, %v1577_v47  ;;  %v1608_v22 = vrot.slane %v1557_v39, 4  ;;  %v2615_v27 = vsel %vm5134_vm15, %v2613_v16, %v3996_v32  ;;  %v1620_v17 = vrot.slane %v1577_v47, 4  ;;  %v5297_v30 = vld [vmem:[#allocation24_spill] sm:$0xff] }
 0x291   :  { %2411 = vrot.lane.b32.xlu1 %v1517_v13, %s2855_s20  ;;  %v2160_v34 = vpop.permute.xlu2 %2159  ;;  %v1573_v13 = vsel %vm290_vm0, %v1541_v12, %v1572_v20  ;;  %v1597_v20 = vsel %vm290_vm0, %v4293_v18, %v1596_v63  ;;  %v5296_v12 = vld [vmem:[#allocation35_spill] sm:$0xff]  ;;  %v1670_v1 = vrot.slane %v5297_v30, 4  ;;  %vm5125_vm11 = vcmask 687104  }
 0x292   :  { %v1659_v11 = vsel %vm290_vm0, %v1658_v62, %v5296_v12  ;;  %v4424_v8 = vperm.slane %v1573_v13, %v3095_v59  ;;  %v2617_v39 = vsel %vm5123_vm13, %v2615_v27, %v2160_v34  ;;  %v4429_v3 = vperm.slane %v1607_v37, %v3095_v59  ;;  %v5298_v37 = vld [vmem:[#allocation72_spill] sm:$0xff] }
 0x293   :  { %v4413_v21 = vpop.permute.xlu1 %2243  ;;  %vm5124_vm12 = vcmask 719872   ;;  %v1621_v63 = vsel %vm290_vm0, %v1601_v36, %v1620_v17  ;;  %v4435_v32 = vperm.slane %v1597_v20, %v3095_v59  ;;  %v1660_v62 = vrot.slane %v5296_v12, 4 }
 0x294   :  { %v1609_v47 = vsel %vm290_vm0, %v1569_v60, %v1608_v22  ;;  %v4440_v13 = vperm.slane %v1659_v11, %v3066_v53  ;;  %v1176_v34 = vrot.slane %v3943_v24, 4  ;;  %v1647_v16 = vsel %vm290_vm0, %v1646_v2, %v5295_v61 }
 0x295   :  { %2415 = vrot.lane.b32.xlu0 %v1519_v23, %s2872_s8  ;;  %v1582_v23 = vrot.slane %v1545_v29, 4  ;;  %v1649_v36 = vsel %vm290_vm0, %v5294_v33, %v1648_v40  ;;  %v1671_v60 = vsel %vm290_vm0, %v1670_v1, %v5298_v37  ;;  %vm5126_vm13 = vcmask 752640  }
 0x296   :  { %v1177_v2 = vsel %vm290_vm0, %v3912_v58, %v1176_v34  ;;  %v1626_v61 = vrot.slane %v4429_v3, 4  ;;  %v4463_v40 = vperm.slane %v1647_v16, %v3066_v53  ;;  %v4466_v20 = vperm.slane %v1649_v36, %v3066_v53  ;;  %v5300_v34 = vld [vmem:[#allocation82_spill] sm:$0xff] }
 0x297   :  { %2299 = vrot.lane.b32.xlu2 %v1171_v48, %s2859_s24  ;;  %v4431_v18 = vpop.permute.xlu0 %2247  ;;  %v2619_v48 = vsel %vm5125_vm11, %v2617_v39, %v4051_v51  ;;  %v1583_v24 = vsel %vm290_vm0, %v1582_v23, %v4305_v44  ;;  %v1617_v51 = vperm.slane %v1609_v47, %v3095_v59  ;;  %v1672_v12 = vrot.slane %v5298_v37, 4  ;;  %v5302_v37 = vld [vmem:[#allocation8_spill] sm:$0xff] }
 0x298   :  { %v1708_v11 = vrot.slane %v4440_v13, 4  ;;  %v4475_v27 = vperm.slane %v1583_v24, %v3095_v59  ;;  %v1585_v17 = vsel %vm290_vm0, %v1545_v29, %v1584_v35  ;;  %v4483_v1 = vperm.slane %v1671_v60, %v3066_v53  ;;  %v5301_v29 = vld [vmem:[#allocation40_spill] sm:$0xff] }
 0x299   :  { %2423 = vrot.lane.b32.xlu1 %v1619_v19, %s2859_s24  ;;  %v2168_v57 = vpop.permute.xlu2 %2167  ;;  %v1624_v19 = vrot.slane %v4424_v8, 4  ;;  %v1673_v23 = vsel %vm290_vm0, %v5297_v30, %v1672_v12  ;;  %vm5127_vm11 = vcmask 818176   ;;  %v1994_v16 = vrot.slane %v5300_v34, 4  ;;  %v5304_v12 = vld [vmem:[#allocation42_spill] sm:$0xff] }
 0x29a   :  { %v2621_v22 = vsel %vm5124_vm12, %v2619_v48, %v2168_v57  ;;  %vm5128_vm12 = vcmask 785408   ;;  %v1627_v44 = vsel %vm290_vm0, %v1626_v61, %v4475_v27  ;;  %v1630_v35 = vrot.slane %v1617_v51, 4 }
 0x29b   :  { %v1625_v33 = vsel %vm290_vm0, %v4435_v32, %v1624_v19  ;;  %v2623_v58 = vsel %vm5126_vm13, %v2621_v22, %v4104_v41  ;;  %v4485_v39 = vpop.permute.xlu1 %2255  ;;  %v1182_v41 = vrot.slane %v4004_v49, 4  ;;  %v1944_v36 = vrot.slane %v5301_v29, 4 }
 0x29c   :  { %v2625_v30 = vsel %vm5128_vm12, %v2623_v58, %v4122_v38  ;;  %v1593_v48 = vperm.slane %v1585_v17, %v3095_v59  ;;  %v1709_v49 = vsel %vm290_vm0, %v4483_v1, %v1708_v11  ;;  %v1661_v19 = vsel %vm290_vm0, %v5293_v0, %v1660_v62  ;;  %v5303_v38 = vld [vmem:[#allocation55_spill] sm:$0xff]  ;;  %v5305_v11 = vld [vmem:[#allocation36_spill] sm:$0xff] }
 0x29d   :  { %2427 = vrot.lane.b32.xlu0 %v1621_v63, %s2873_s9  ;;  %v5299_v63 = vld [vmem:[#allocation81_spill] sm:$0xff]  ;;  %v1782_v60 = vrot.slane %v5302_v37, 4  ;;  %vm5129_vm13 = vcmask 850944   ;;  %v1681_v61 = vperm.slane %v1673_v23, %v3066_v53  ;;  %v1183_v58 = vsel %vm290_vm0, %v1182_v41, %v5304_v12  ;;  %v5306_v0 = vld [vmem:[#allocation44_spill] sm:$0xff] }
 0x29e   :  { %v2006_v47 = vrot.slane %v5299_v63, 4  ;;  %v1995_v62 = vsel %vm290_vm0, %v1994_v16, %v5306_v0  ;;  %v1631_v63 = vsel %vm290_vm0, %v1630_v35, %v1593_v48  ;;  %v1717_v34 = vperm.slane %v1709_v49, %v3095_v59  ;;  %v5307_v23 = vld [vmem:[#allocation41_spill] sm:$0xff]  ;;  %v5310_v0 = vld [vmem:[#allocation56_spill] sm:$0xff] }
 0x29f   :  { %2311 = vrot.lane.b32.xlu2 %v1177_v2, %s2862_s27  ;;  %v4502_v22 = vpop.permute.xlu0 %2259  ;;  %v1694_v2 = vrot.slane %v4466_v20, 4  ;;  %v4523_v41 = vsel %vm290_vm0, %v5307_v23, %v1944_v36  ;;  %vm5130_vm12 = vcmask 916480   ;;  %v1632_v35 = vrot.slane %v1593_v48, 4 }
 0x2a0   :  { %v2007_v17 = vsel %vm290_vm0, %v2006_v47, %v5305_v11  ;;  %v5308_v47 = vld [vmem:[#allocation73_spill] sm:$0xff]  ;;  %v1685_v29 = vsel %vm290_vm0, %v4463_v40, %v1684_v31  ;;  %v2001_v37 = vperm.slane %v1995_v62, %v3066_v53  ;;  %v1286_v48 = vrot.slane %v4058_v5, 4 }
 0x2a1   :  { %2435 = vrot.lane.b32.xlu1 %v1625_v33, %s2862_s27  ;;  %v2180_v57 = vpop.permute.xlu2 %2179  ;;  %v1758_v33 = vrot.slane %v5303_v38, 4  ;;  %v1783_v16 = vsel %vm290_vm0, %v1782_v60, %v5308_v47  ;;  %v1633_v60 = vsel %vm290_vm0, %v1617_v51, %v1632_v35  ;;  %v1734_v12 = vrot.slane %v1717_v34, 4  ;;  %v5311_v51 = vld [vmem:[#allocation38_spill] sm:$0xff] }
 0x2a2   :  { %v2627_v24 = vsel %vm5127_vm11, %v2625_v30, %v2180_v57  ;;  %v1669_v57 = vperm.slane %v1661_v19, %v3066_v53  ;;  %vm5131_vm11 = vcmask 883712   ;;  %v5309_v30 = vld [vmem:[#allocation79_spill] sm:$0xff]  ;;  %v2013_v19 = vperm.slane %v2007_v17, %v3066_v53  ;;  %v5312_v35 = vld [vmem:[#allocation70_spill] sm:$0xff] }
 0x2a3   :  { %v1770_v49 = vrot.slane %v5309_v30, 4  ;;  %v4539_v11 = vperm.slane %v1783_v16, %v3066_v53  ;;  %v4541_v31 = vpop.permute.xlu1 %2267  ;;  %v1759_v62 = vsel %vm290_vm0, %v1758_v33, %v5310_v0  ;;  %v1695_v23 = vsel %vm290_vm0, %v1694_v2, %v4371_v15  ;;  %v5313_v2 = vld [vmem:[#allocation22_spill] sm:$0xff] }
 0x2a4   :  { %v1287_v30 = vsel %vm290_vm0, %v1286_v48, %v5312_v35  ;;  %v4567_v48 = vperm.slane %v1695_v23, %v3095_v59 }
 0x2a5   :  { %2439 = vrot.lane.b32.xlu0 %v1627_v44, %s2874_s10  ;;  %v2629_v44 = vsel %vm5129_vm13, %v2627_v24, %v4152_v45  ;;  %v1718_v45 = vrot.slane %v1681_v61, 4  ;;  %vm2634_vm13 = vcmask 949248   ;;  %v1771_v5 = vsel %vm290_vm0, %v1770_v49, %v5311_v51 }
 0x2a6   :  { %v2631_v36 = vsel %vm5131_vm11, %v2629_v44, %v4174_v10  ;;  %v1693_v10 = vperm.slane %v1685_v29, %v3095_v59  ;;  %v2044_v44 = vrot.slane %v2001_v37, 4  ;;  %vm2638_vm11 = vcmask 1014784  }
 0x2a7   :  { %2323 = vrot.lane.b32.xlu2 %v1183_v58, %s2865_s30  ;;  %v1720_v58 = vrot.slane %v1669_v57, 4  ;;  %v4552_v47 = vpop.permute.xlu0 %2271  ;;  %v1719_v29 = vsel %vm290_vm0, %v1718_v45, %v1669_v57 }
 0x2a8   :  { %v1735_v33 = vsel %vm290_vm0, %v1734_v12, %v1693_v10  ;;  %v1777_v12 = vperm.slane %v1771_v5, %v3066_v53  ;;  %v1696_v5 = vrot.slane %v4371_v15, 4 }
 0x2a9   :  { %2447 = vrot.lane.b32.xlu1 %v1631_v63, %s2865_s30  ;;  %v2192_v24 = vpop.permute.xlu2 %2191  ;;  %v2042_v63 = vrot.slane %v2013_v19, 4  ;;  %v1721_v49 = vsel %vm290_vm0, %v1681_v61, %v1720_v58  ;;  %v4576_v58 = vsel %vm290_vm0, %v2013_v19, %v2044_v44  ;;  %v1760_v44 = vrot.slane %v5310_v0, 4 }
 0x2aa   :  { %v2633_v17 = vsel %vm5130_vm12, %v2631_v36, %v2192_v24  ;;  %vm2636_vm12 = vcmask 982016   ;;  %v1818_v24 = vrot.slane %v4539_v11, 4  ;;  %v1746_v36 = vrot.slane %v5313_v2, 4 }
 0x2ab   :  { %v2635_v16 = vsel %vm2634_vm13, %v2633_v17, %v4195_v50  ;;  %v1765_v50 = vperm.slane %v1759_v62, %v3066_v53  ;;  %v4573_v45 = vsel %vm290_vm0, %v2042_v63, %v2001_v37  ;;  %v4584_v51 = vperm.slane %v1721_v49, %v3095_v59  ;;  %v5314_v37 = vld [vmem:[#allocation23_spill] sm:$0xff] }
 0x2ac   :  { %v2637_v61 = vsel %vm2636_vm12, %v2635_v16, %v4210_v52  ;;  %v1819_v52 = vsel %vm290_vm0, %v1818_v24, %v1777_v12  ;;  %v1747_v19 = vsel %vm290_vm0, %v1746_v36, %v5314_v37  ;;  %v1292_v63 = vrot.slane %v4091_v9, 4  ;;  %v4594_v16 = vpop.permute.xlu1 %2279 }
 0x2ad   :  { %2451 = vrot.lane.b32.xlu0 %v1633_v60, %s2875_s29  ;;  %v1736_v60 = vrot.slane %v1693_v10, 4  ;;  %v4581_v10 = vperm.slane %v1719_v29, %v3095_v59  ;;  %v1794_v23 = vrot.slane %v1765_v50, 4  ;;  %v1697_v15 = vsel %vm290_vm0, %v4466_v20, %v1696_v5  ;;  %v5315_v5 = vld [vmem:[#allocation78_spill] sm:$0xff] }
 0x2ae   :  { %v1293_v35 = vsel %vm290_vm0, %v4047_v26, %v1292_v63  ;;  %v1825_v9 = vperm.slane %v1819_v52, %v3095_v59  ;;  %v1753_v29 = vperm.slane %v1747_v19, %v3066_v53  ;;  %v4610_v20 = vperm.slane %v1697_v15, %v3095_v59 }
 0x2af   :  { %2335 = vrot.lane.b32.xlu2 %v1287_v30, %s2856_s21  ;;  %v1737_v62 = vsel %vm290_vm0, %v1717_v34, %v1736_v60  ;;  %v1740_v34 = vrot.slane %v4567_v48, 4  ;;  %v4607_v0 = vpop.permute.xlu0 %2283  ;;  %v1761_v24 = vsel %vm290_vm0, %v5303_v38, %v1760_v44  ;;  %v1394_v60 = vrot.slane %v4156_v7, 4 }
 0x2b0   :  { %v1795_v26 = vsel %vm290_vm0, %v1794_v23, %v1753_v29  ;;  %v834_v52 = vrot.slane %v5315_v5, 4  ;;  %v1769_v63 = vperm.slane %v1761_v24, %v3066_v53 }
 0x2b1   :  { %2459 = vrot.lane.b32.xlu1 %v1735_v33, %s2856_s21  ;;  %v2204_v57 = vpop.permute.xlu2 %2203  ;;  %v1741_v30 = vsel %vm290_vm0, %v4581_v10, %v1740_v34  ;;  %v1742_v33 = vrot.slane %v4584_v51, 4  ;;  %v1801_v19 = vperm.slane %v1795_v26, %v3095_v59  ;;  %v5316_v34 = vld [vmem:[#allocation57_spill] sm:$0xff]  ;;  %v1395_v7 = vsel %vm290_vm0, %v1394_v60, %v4146_v28 }
 0x2b2   :  { %v2639_v17 = vsel %vm2638_vm11, %v2637_v61, %v2204_v57  ;;  %v1842_v57 = vrot.slane %v1825_v9, 4  ;;  %v1796_v61 = vrot.slane %v1753_v29, 4  ;;  %v1870_v44 = vrot.slane %v5316_v34, 4  ;;  %v5318_v29 = vld [vmem:[#allocation58_spill] sm:$0xff] }
 0x2b3   :  { %2733 = vst [vmem:[#allocation5] sm:$0xff] %v2639_v17  ;;  %v1743_v36 = vsel %vm290_vm0, %v1742_v33, %v4610_v20  ;;  %v1820_v17 = vrot.slane %v1777_v12, 4  ;;  %v1806_v33 = vrot.slane %v1769_v63, 4 }
 0x2b4   :  { %v1797_v38 = vsel %vm290_vm0, %v1765_v50, %v1796_v61  ;;  %v1843_v23 = vsel %vm290_vm0, %v1842_v57, %v1801_v19  ;;  %v4628_v12 = vpop.permute.xlu1 %2291  ;;  %v5317_v50 = vld [vmem:[#allocation75_spill] sm:$0xff]  ;;  %v1871_v26 = vsel %vm290_vm0, %v1870_v44, %v5318_v29 }
 0x2b5   :  { %2463 = vrot.lane.b32.xlu0 %v1737_v62, %s2851_s16  ;;  %v1748_v62 = vrot.slane %v5314_v37, 4  ;;  %v1821_v37 = vsel %vm290_vm0, %v4539_v11, %v1820_v17  ;;  %v4639_v28 = vperm.slane %v1797_v38, %v3095_v59  ;;  %v5319_v11 = vld [vmem:[#allocation9_spill] sm:$0xff]  ;;  %v5321_v44 = vld [vmem:[#allocation43_spill] sm:$0xff] }
 0x2b6   :  { %v4647_v60 = vperm.slane %v5319_v11, %v3095_v59  ;;  %v4655_v17 = vperm.slane %v1821_v37, %v3095_v59 }
 0x2b7   :  { %2347 = vrot.lane.b32.xlu2 %v1293_v35, %s2848_s13  ;;  %v1749_v15 = vsel %vm290_vm0, %v5313_v2, %v1748_v62  ;;  %v835_v35 = vsel %vm290_vm0, %v834_v52, %v5317_v50  ;;  %v4651_v57 = vpop.permute.xlu0 %2295  ;;  %v5320_v52 = vld [vmem:[#allocation25_spill] sm:$0xff]  ;;  %v1848_v38 = vrot.slane %v4639_v28, 4 }
 0x2b8   :  { %v2640_v24 = vsel %vm2578_vm1, %v835_v35, %v4234_v6  ;;  %v1757_v62 = vperm.slane %v1749_v15, %v3066_v53  ;;  %v1400_v6 = vrot.slane %v4191_v56, 4  ;;  %v1850_v15 = vrot.slane %v4647_v60, 4  ;;  %v5323_v56 = vld [vmem:[#allocation39_spill] sm:$0xff] }
 0x2b9   :  { %2471 = vrot.lane.b32.xlu1 %v1741_v30, %s2848_s13  ;;  %v2216_v49 = vpop.permute.xlu2 %2215  ;;  %v1844_v30 = vrot.slane %v1801_v19, 4  ;;  %v2641_v2 = vsel %vm2580_vm2, %v2640_v24, %v4259_v43  ;;  %v1858_v19 = vrot.slane %v5320_v52, 4  ;;  %v1877_v43 = vperm.slane %v1871_v26, %v3066_v53  ;;  %s5352_s13 = smov 116  }
 0x2ba   :  { %v2642_v5 = vsel %vm2582_vm3, %v2641_v2, %v2216_v49  ;;  %v1849_v49 = vsel %vm290_vm0, %v4655_v17, %v1848_v38  ;;  %v1841_v50 = vperm.slane %v5323_v56, %v3095_v59  ;;  %v1808_v35 = vrot.slane %v1757_v62, 4 }
 0x2bb   :  { %v1845_v61 = vsel %vm290_vm0, %v1825_v9, %v1844_v30  ;;  %v1401_v9 = vsel %vm290_vm0, %v5321_v44, %v1400_v6  ;;  %v5324_v30 = vld [vmem:[#allocation26_spill] sm:$0xff]  ;;  %v1872_v24 = vrot.slane %v5318_v29, 4  ;;  %v1906_v11 = vrot.slane %v1877_v43, 4 }
 0x2bc   :  { %v1859_v26 = vsel %vm290_vm0, %v1858_v19, %v5324_v30  ;;  %v4682_v2 = vpop.permute.xlu1 %2303  ;;  %v5326_v19 = vld [vmem:[#allocation64_spill] sm:$0xff] }
 0x2bd   :  { %2475 = vrot.lane.b32.xlu0 %v1743_v36, %s2849_s14 }
 0x2bf   :  { %2359 = vrot.lane.b32.xlu2 %v1395_v7, %s2852_s17  ;;  %v1807_v7 = vsel %vm290_vm0, %v1806_v33, %v1757_v62  ;;  %v1809_v62 = vsel %vm290_vm0, %v1769_v63, %v1808_v35  ;;  %v4693_v29 = vpop.permute.xlu0 %2307 }
 0x2c0   :  { %v4679_v33 = vperm.slane %v1807_v7, %v3095_v59  ;;  %v1854_v7 = vrot.slane %v1841_v50, 4 }
 0x2c1   :  { %2483 = vrot.lane.b32.xlu1 %v1843_v23, %s2852_s17  ;;  %v2228_v36 = vpop.permute.xlu2 %2227  ;;  %v5322_v23 = vld [vmem:[#allocation45_spill] sm:$0xff] }
 0x2c2   :  { %v2643_v37 = vsel %vm2584_vm4, %v2642_v5, %v5322_v23  ;;  %v1851_v44 = vsel %vm290_vm0, %v1850_v15, %v4679_v33  ;;  %v1865_v23 = vperm.slane %v1859_v26, %v3066_v53  ;;  %v5327_v15 = vld [vmem:[#allocation10_spill] sm:$0xff]  ;;  %v1860_v26 = vrot.slane %v5324_v30, 4 }
 0x2c3   :  { %v5329_v30 = vld [vmem:[#allocation86_spill] sm:$0xff] }
 0x2c4   :  { %v1907_v63 = vsel %vm290_vm0, %v1906_v11, %v1865_v23 }
 0x2c5   :  { %2487 = vrot.lane.b32.xlu0 %v1845_v61, %s2854_s19  ;;  %v5325_v61 = vld [vmem:[#allocation12_spill] sm:$0xff]  ;;  %v4710_v11 = vperm.slane %v1907_v63, %v3095_v59 }
 0x2c6   :  { %v2644_v5 = vsel %vm2586_vm5, %v2643_v37, %v5325_v61 }
 0x2c7   :  { %2371 = vrot.lane.b32.xlu2 %v1401_v9, %s2860_s25  ;;  %v2645_v38 = vsel %vm2588_vm6, %v2644_v5, %v2228_v36  ;;  %v1406_v9 = vrot.slane %v5326_v19, 4  ;;  %v1873_v36 = vsel %vm290_vm0, %v5316_v34, %v1872_v24  ;;  %v4721_v19 = vperm.slane %v5329_v30, %v3095_v59 }
 0x2c8   :  { %v2646_v37 = vsel %vm5135_vm7, %v2645_v38, %v4354_v46  ;;  %v1881_v34 = vperm.slane %v1873_v36, %v3066_v53  ;;  %v5328_v38 = vld [vmem:[#allocation85_spill] sm:$0xff]  ;;  %v5331_v36 = vld [vmem:[#allocation59_spill] sm:$0xff] }
 0x2c9   :  { %2495 = vrot.lane.b32.xlu1 %v1849_v49, %s2860_s25  ;;  %v2240_v6 = vpop.permute.xlu2 %2239  ;;  %v1817_v49 = vperm.slane %v1809_v62, %v3095_v59  ;;  %v1407_v56 = vsel %vm290_vm0, %v1406_v9, %v5327_v15  ;;  %v2647_v61 = vsel %vm5136_vm8, %v2646_v37, %v4380_v42  ;;  %v1908_v42 = vrot.slane %v1865_v23, 4  ;;  %v4723_v9 = vpop.permute.xlu1 %2315  ;;  %v5332_v23 = vld [vmem:[#allocation27_spill] sm:$0xff] }
 0x2ca   :  { %v2648_v24 = vsel %vm5133_vm9, %v2647_v61, %v2240_v6  ;;  %v1956_v37 = vrot.slane %v4710_v11, 4  ;;  %v1918_v63 = vrot.slane %v1881_v34, 4  ;;  %v1982_v15 = vrot.slane %v5331_v36, 4  ;;  %v4736_v61 = vpop.permute.xlu0 %2319 }
 0x2cb   :  { %v1855_v35 = vsel %vm290_vm0, %v1854_v7, %v1817_v49  ;;  %v1856_v46 = vrot.slane %v1817_v49, 4  ;;  %v1861_v7 = vsel %vm290_vm0, %v5320_v52, %v1860_v26  ;;  %v2649_v6 = vsel %vm5132_vm10, %v2648_v24, %v4413_v21 }
 0x2cc   :  { %v1958_v26 = vrot.slane %v4721_v19, 4  ;;  %v1869_v24 = vperm.slane %v1861_v7, %v3066_v53  ;;  %vm5334_vm10 = vcmask 359424   ;;  %vm5335_vm9 = vcmask 392192  }
 0x2cd   :  { %2499 = vrot.lane.b32.xlu0 %v1851_v44, %s2863_s28  ;;  %v1857_v62 = vsel %vm290_vm0, %v1841_v50, %v1856_v46  ;;  %v4717_v44 = vperm.slane %v5328_v38, %v3095_v59  ;;  %v5330_v50 = vld [vmem:[#allocation11_spill] sm:$0xff]  ;;  %v5333_v46 = vld [vmem:[#allocation30_spill] sm:$0xff] }
 0x2ce   :  { %v1508_v49 = vrot.slane %v5330_v50, 4  ;;  %v5336_v50 = vld [vmem:[#allocation60_spill] sm:$0xff] }
 0x2cf   :  { %2383 = vrot.lane.b32.xlu2 %v1407_v56, %s2867_s3  ;;  %v1909_v56 = vsel %vm290_vm0, %v1877_v43, %v1908_v42  ;;  %v1957_v21 = vsel %vm290_vm0, %v4717_v44, %v1956_v37  ;;  %v1919_v42 = vsel %vm290_vm0, %v1918_v63, %v1869_v24  ;;  %v1920_v37 = vrot.slane %v1869_v24, 4 }
 0x2d0   :  { %v1509_v52 = vsel %vm290_vm0, %v5333_v46, %v1508_v49  ;;  %v4750_v38 = vperm.slane %v1909_v56, %v3095_v59  ;;  %v1983_v49 = vsel %vm290_vm0, %v1982_v15, %v5336_v50  ;;  %v1925_v46 = vperm.slane %v1919_v42, %v3095_v59 }
 0x2d1   :  { %2507 = vrot.lane.b32.xlu1 %v1855_v35, %s2867_s3  ;;  %v2252_v5 = vpop.permute.xlu2 %2251  ;;  %v1949_v35 = vperm.slane %v5332_v23, %v3095_v59  ;;  %v1984_v63 = vrot.slane %v5336_v50, 4  ;;  %v1989_v15 = vperm.slane %v1983_v49, %v3066_v53 }
 0x2d2   :  { %v1959_v7 = vsel %vm290_vm0, %v1958_v26, %v4750_v38  ;;  %v4778_v42 = vpop.permute.xlu0 %2331 }
 0x2d5   :  { %2511 = vrot.lane.b32.xlu0 %v1857_v62, %s2868_s4  ;;  %v2650_v62 = vsel %vm5334_vm10, %v2649_v6, %v4431_v18  ;;  %v1514_v18 = vrot.slane %v4334_v25, 4  ;;  %v1962_v6 = vrot.slane %v1949_v35, 4  ;;  %vm5337_vm10 = vcmask 424960  }
 0x2d6   :  { %v2651_v43 = vsel %vm5335_vm9, %v2650_v62, %v2252_v5  ;;  %v5338_v5 = vld [vmem:[#allocation28_spill] sm:$0xff]  ;;  %vm5339_vm9 = vcmask 490496   ;;  %v5340_v62 = vld [vmem:[#allocation29_spill] sm:$0xff] }
 0x2d7   :  { %2395 = vrot.lane.b32.xlu2 %v1509_v52, %s2869_s5  ;;  %v2652_v23 = vsel %vm5337_vm10, %v2651_v43, %v4485_v39  ;;  %v1970_v56 = vrot.slane %v5338_v5, 4  ;;  %v4765_v52 = vpop.permute.xlu1 %2327  ;;  %v1515_v39 = vsel %vm290_vm0, %v1514_v18, %v4323_v4  ;;  %v1963_v26 = vsel %vm290_vm0, %v1962_v6, %v1925_v46 }
 0x2d8   :  { %v2653_v25 = vsel %vm2604_vm14, %v2652_v23, %v4502_v22  ;;  %v1985_v4 = vsel %vm290_vm0, %v5331_v36, %v1984_v63  ;;  %v2018_v22 = vrot.slane %v1989_v15, 4  ;;  %vm5341_vm10 = vcmask 523264  }
 0x2d9   :  { %2519 = vrot.lane.b32.xlu1 %v1957_v21, %s2869_s5  ;;  %v2264_v30 = vpop.permute.xlu2 %2263  ;;  %v1921_v21 = vsel %vm290_vm0, %v1881_v34, %v1920_v37  ;;  %v1971_v43 = vsel %vm290_vm0, %v1970_v56, %v5340_v62  ;;  %v1964_v34 = vrot.slane %v1925_v46, 4  ;;  %v4790_v18 = vperm.slane %v4523_v41, %v3095_v59 }
 0x2da   :  { %v2654_v24 = vsel %vm5339_vm9, %v2653_v25, %v2264_v30  ;;  %v4781_v50 = vperm.slane %v1921_v21, %v3095_v59  ;;  %v4794_v6 = vperm.slane %v4573_v45, %v3095_v59  ;;  %v1977_v37 = vperm.slane %v1971_v43, %v3066_v53  ;;  %v4825_v43 = vpop.permute.xlu0 %2343 }
 0x2db   :  { %v2655_v30 = vsel %vm5341_vm10, %v2654_v24, %v4541_v31  ;;  %v1520_v36 = vrot.slane %v4383_v54, 4  ;;  %v1972_v23 = vrot.slane %v5340_v62, 4  ;;  %vm5342_vm9 = vcmask 556032  }
 0x2dc   :  { %v1968_v31 = vrot.slane %v4781_v50, 4  ;;  %v2656_v41 = vsel %vm5342_vm9, %v2655_v30, %v4552_v47  ;;  %v2019_v45 = vsel %vm290_vm0, %v2018_v22, %v1977_v37  ;;  %vm5343_vm10 = vcmask 588800  }
 0x2dd   :  { %2523 = vrot.lane.b32.xlu0 %v1959_v7, %s2870_s6  ;;  %v1965_v7 = vsel %vm290_vm0, %v1949_v35, %v1964_v34  ;;  %v1993_v35 = vperm.slane %v1985_v4, %v3066_v53  ;;  %v1521_v56 = vsel %vm290_vm0, %v4341_v14, %v1520_v36  ;;  %v2066_v54 = vrot.slane %v4794_v6, 4 }
 0x2de   :  { %v1969_v63 = vsel %vm290_vm0, %v4790_v18, %v1968_v31  ;;  %v2053_v21 = vperm.slane %v4576_v58, %v3095_v59  ;;  %v2020_v25 = vrot.slane %v1977_v37, 4  ;;  %v1973_v14 = vsel %vm290_vm0, %v5338_v5, %v1972_v23 }
 0x2df   :  { %2407 = vrot.lane.b32.xlu2 %v1515_v39, %s2871_s7  ;;  %v4813_v39 = vpop.permute.xlu1 %2339  ;;  %v4820_v47 = vperm.slane %v2019_v45, %v3095_v59  ;;  %v1622_v4 = vrot.slane %v4435_v32, 4  ;;  %v1981_v5 = vperm.slane %v1973_v14, %v3066_v53  ;;  %vm5344_vm9 = vcmask 654336   ;;  %v5348_v45 = vld [vmem:[#allocation84_spill] sm:$0xff] }
 0x2e0   :  { %v2021_v58 = vsel %vm290_vm0, %v1989_v15, %v2020_v25  ;;  %v2070_v22 = vrot.slane %v2053_v21, 4  ;;  %v1682_v36 = vrot.slane %v4463_v40, 4 }
 0x2e1   :  { %2531 = vrot.lane.b32.xlu1 %v1963_v26, %s2871_s7  ;;  %v2276_v49 = vpop.permute.xlu2 %2275  ;;  %v2030_v26 = vrot.slane %v1993_v35, 4  ;;  %v2067_v34 = vsel %vm290_vm0, %v2066_v54, %v4820_v47 }
 0x2e2   :  { %v2657_v46 = vsel %vm5343_vm10, %v2656_v41, %v2276_v49  ;;  %vm5345_vm10 = vcmask 687104   ;;  %v5347_v41 = vld [vmem:[#allocation83_spill] sm:$0xff]  ;;  %v2356_v40 = vpop.permute.xlu0 %2355 }
 0x2e3   :  { %v2658_v24 = vsel %vm5134_vm15, %v2657_v46, %v4594_v16  ;;  %v2029_v16 = vperm.slane %v2021_v58, %v3095_v59  ;;  %v2031_v15 = vsel %vm290_vm0, %v2030_v26, %v1981_v5  ;;  %vm5346_vm15 = vcmask 719872  }
 0x2e4   :  { %v2659_v49 = vsel %vm5344_vm9, %v2658_v24, %v4607_v0  ;;  %v4845_v0 = vperm.slane %v2031_v15, %v3095_v59  ;;  %v4857_v46 = vperm.slane %v5348_v45, %v3095_v59  ;;  %vm5350_vm9 = vcmask 785408  }
 0x2e5   :  { %2535 = vrot.lane.b32.xlu0 %v1965_v7, %s2855_s20  ;;  %v1623_v7 = vsel %vm290_vm0, %v1622_v4, %v4424_v8  ;;  %v2071_v37 = vsel %vm290_vm0, %v2070_v22, %v2029_v16  ;;  %v2072_v32 = vrot.slane %v2029_v16, 4  ;;  %v1683_v24 = vsel %vm290_vm0, %v1682_v36, %v4368_v55 }
 0x2e6   :  { %v2076_v14 = vrot.slane %v4845_v0, 4 }
 0x2e7   :  { %2419 = vrot.lane.b32.xlu2 %v1521_v56, %s2858_s23  ;;  %v4848_v23 = vpop.permute.xlu1 %2351  ;;  %v2073_v8 = vsel %vm290_vm0, %v2053_v21, %v2072_v32  ;;  %v4853_v56 = vperm.slane %v5347_v41, %v3095_v59  ;;  %v1628_v21 = vrot.slane %v4475_v27, 4 }
 0x2e9   :  { %2543 = vrot.lane.b32.xlu1 %v1969_v63, %s2858_s23  ;;  %v2288_v62 = vpop.permute.xlu2 %2287  ;;  %v1706_v63 = vrot.slane %v4483_v1, 4  ;;  %v1629_v1 = vsel %vm290_vm0, %v4429_v3, %v1628_v21  ;;  %v4884_v3 = vperm.slane %v1683_v24, %v3095_v59 }
 0x2ea   :  { %v2660_v30 = vsel %vm5345_vm10, %v2659_v49, %v2288_v62  ;;  %v2078_v62 = vrot.slane %v4857_v46, 4  ;;  %vm5351_vm10 = vcmask 818176   ;;  %v2368_v49 = vpop.permute.xlu0 %2367 }
 0x2eb   :  { %v2661_v53 = vsel %vm5346_vm15, %v2660_v30, %v4628_v12  ;;  %v2032_v12 = vrot.slane %v1981_v5, 4  ;;  %vm5349_vm15 = vcmask 752640   ;;  %v1707_v27 = vsel %vm290_vm0, %v1706_v63, %v4440_v13 }
 0x2ec   :  { %v2662_v54 = vsel %vm5349_vm15, %v2661_v53, %v4651_v57  ;;  %v2077_v57 = vsel %vm290_vm0, %v4853_v56, %v2076_v14  ;;  %vm5353_vm15 = vcmask 850944   ;;  %v4891_v4 = vperm.slane %v1707_v27, %v3095_v59 }
 0x2ed   :  { %2547 = vrot.lane.b32.xlu0 %v2067_v34, %s2859_s24  ;;  %v2033_v26 = vsel %vm290_vm0, %v1993_v35, %v2032_v12  ;;  %v1732_v13 = vrot.slane %v4884_v3, 4 }
 0x2ee   :  { %v4881_v55 = vperm.slane %v2033_v26, %v3095_v59 }
 0x2ef   :  { %2431 = vrot.lane.b32.xlu2 %v1623_v7, %s2861_s26  ;;  %v2364_v22 = vpop.permute.xlu1 %2363  ;;  %v1738_v7 = vrot.slane %v4581_v10, 4 }
 0x2f1   :  { %2555 = vrot.lane.b32.xlu1 %v2071_v37, %s2861_s26  ;;  %v2300_v31 = vpop.permute.xlu2 %2299 }
 0x2f2   :  { %v2663_v25 = vsel %vm5350_vm9, %v2662_v54, %v2300_v31  ;;  %vm5354_vm9 = vcmask 883712   ;;  %v2380_v32 = vpop.permute.xlu0 %2379  ;;  %v1744_v31 = vrot.slane %v4610_v20, 4  ;;  %v1846_v54 = vrot.slane %v4655_v17, 4 }
 0x2f3   :  { %v2664_v58 = vsel %vm5351_vm10, %v2663_v25, %v4682_v2  ;;  %v2079_v2 = vsel %vm290_vm0, %v2078_v62, %v4881_v55  ;;  %vm5355_vm10 = vcmask 916480   ;;  %v1852_v17 = vrot.slane %v4679_v33, 4 }
 0x2f4   :  { %v2665_v34 = vsel %vm5353_vm15, %v2664_v58, %v4693_v29  ;;  %v1733_v29 = vsel %vm290_vm0, %v4891_v4, %v1732_v13  ;;  %v1745_v41 = vsel %vm290_vm0, %v4584_v51, %v1744_v31  ;;  %v1847_v51 = vsel %vm290_vm0, %v1846_v54, %v4639_v28 }
 0x2f5   :  { %2559 = vrot.lane.b32.xlu0 %v2073_v8, %s2862_s27  ;;  %v5356_v8 = vld [vmem:[#allocation71_spill] sm:$0xff]  ;;  %vm5358_vm15 = vcmask 293888  }
 0x2f7   :  { %2443 = vrot.lane.b32.xlu2 %v1629_v1, %s5352_s13  ;;  %v2376_v53 = vpop.permute.xlu1 %2375 }
 0x2f9   :  { %2567 = vrot.lane.b32.xlu1 %v2077_v57, %s5352_s13  ;;  %v2312_v35 = vpop.permute.xlu2 %2311 }
 0x2fa   :  { %v2666_v5 = vsel %vm5354_vm9, %v2665_v34, %v2312_v35  ;;  %v2392_v63 = vpop.permute.xlu0 %2391  ;;  %vm5359_vm9 = vcmask 326656  }
 0x2fb   :  { %v2667_v16 = vsel %vm5355_vm10, %v2666_v5, %v4723_v9  ;;  %v1739_v9 = vsel %vm290_vm0, %v1738_v7, %v4567_v48  ;;  %vm5360_vm10 = vcmask 359424  }
 0x2fc   :  { %v2668_v59 = vsel %vm2634_vm13, %v2667_v16, %v4736_v61  ;;  %v1282_v61 = vrot.slane %v5356_v8, 4  ;;  %v2074_v8 = vrot.slane %v4853_v56, 4  ;;  %v2080_v56 = vrot.slane %v4881_v55, 4 }
 0x2fd   :  { %2571 = vrot.lane.b32.xlu0 %v2079_v2, %s2865_s30  ;;  %v1960_v2 = vrot.slane %v4750_v38, 4 }
 0x2ff   :  { %2455 = vrot.lane.b32.xlu2 %v1733_v29, %s2844_s12  ;;  %v2388_v10 = vpop.permute.xlu1 %2387  ;;  %v1966_v29 = vrot.slane %v4790_v18, 4 }
 0x301   :  { %v2324_v30 = vpop.permute.xlu2 %2323 }
 0x302   :  { %v2669_v15 = vsel %vm2636_vm12, %v2668_v59, %v2324_v30  ;;  %v2404_v24 = vpop.permute.xlu0 %2403  ;;  %v1967_v59 = vsel %vm290_vm0, %v1966_v29, %v4781_v50 }
 0x303   :  { %v2670_v37 = vsel %vm2638_vm11, %v2669_v15, %v4765_v52  ;;  %v5357_v52 = vld [vmem:[#allocation68_spill] sm:$0xff] }
 0x304   :  { %2734 = vst [vmem:[#allocation5 + $0x8] sm:$0xff] %v2670_v37  ;;  %v1283_v45 = vsel %vm290_vm0, %v1282_v61, %v5357_v52 }
 0x305   :  { %v2671_v48 = vsel %vm2578_vm1, %v1283_v45, %v4778_v42 }
 0x307   :  { %2467 = vrot.lane.b32.xlu2 %v1739_v9, %s2847_s0  ;;  %v2400_v21 = vpop.permute.xlu1 %2399  ;;  %v2068_v9 = vrot.slane %v4820_v47, 4  ;;  %v2075_v47 = vsel %vm290_vm0, %v2074_v8, %v4845_v0 }
 0x309   :  { %v2336_v36 = vpop.permute.xlu2 %2335 }
 0x30a   :  { %v2672_v20 = vsel %vm2580_vm2, %v2671_v48, %v2336_v36  ;;  %v2416_v35 = vpop.permute.xlu0 %2415 }
 0x30b   :  { %v2673_v25 = vsel %vm2582_vm3, %v2672_v20, %v4813_v39  ;;  %v1853_v39 = vsel %vm290_vm0, %v4647_v60, %v1852_v17  ;;  %v2081_v20 = vsel %vm290_vm0, %v4857_v46, %v2080_v56 }
 0x30c   :  { %v2674_v14 = vsel %vm2584_vm4, %v2673_v25, %v4825_v43  ;;  %v1954_v43 = vrot.slane %v4717_v44, 4 }
 0x30e   :  { %v1955_v33 = vsel %vm290_vm0, %v1954_v43, %v4710_v11 }
 0x30f   :  { %2479 = vrot.lane.b32.xlu2 %v1745_v41, %s2850_s15  ;;  %v2412_v58 = vpop.permute.xlu1 %2411  ;;  %s2744_s15 = sshll.u32 %s5022_s1, 4  ;;  %s2745_s15 = int_to_ptr.hbm [resolvable:$true] %s2744_s15 }
 0x311   :  { %v2348_v12 = vpop.permute.xlu2 %2347 }
 0x312   :  { %v2675_v42 = vsel %vm2586_vm5, %v2674_v14, %v2348_v12  ;;  %v2428_v11 = vpop.permute.xlu0 %2427 }
 0x313   :  { %v2676_v1 = vsel %vm2588_vm6, %v2675_v42, %v4848_v23 }
 0x314   :  { %v2677_v28 = vsel %vm5135_vm7, %v2676_v1, %v2356_v40  ;;  %vm5361_vm7 = vcmask 392192  }
 0x317   :  { %2491 = vrot.lane.b32.xlu2 %v1847_v51, %s2857_s22  ;;  %v2424_v5 = vpop.permute.xlu1 %2423 }
 0x319   :  { %v2360_v26 = vpop.permute.xlu2 %2359 }
 0x31a   :  { %v2678_v57 = vsel %vm5136_vm8, %v2677_v28, %v2360_v26  ;;  %vm5362_vm8 = vcmask 424960   ;;  %v2440_v37 = vpop.permute.xlu0 %2439 }
 0x31b   :  { %v2679_v27 = vsel %vm5358_vm15, %v2678_v57, %v2364_v22  ;;  %v1961_v22 = vsel %vm290_vm0, %v4721_v19, %v1960_v2  ;;  %vm5363_vm15 = vcmask 490496  }
 0x31c   :  { %v2680_v23 = vsel %vm5359_vm9, %v2679_v27, %v2368_v49  ;;  %vm5364_vm9 = vcmask 523264  }
 0x31f   :  { %2503 = vrot.lane.b32.xlu2 %v1853_v39, %s2866_s2  ;;  %v2436_v15 = vpop.permute.xlu1 %2435 }
 0x321   :  { %v2372_v62 = vpop.permute.xlu2 %2371 }
 0x322   :  { %v2681_v60 = vsel %vm5360_vm10, %v2680_v23, %v2372_v62  ;;  %vm5367_vm10 = vcmask 621568   ;;  %v2452_v41 = vpop.permute.xlu0 %2451 }
 0x323   :  { %v2682_v40 = vsel %vm5361_vm7, %v2681_v60, %v2376_v53  ;;  %vm5365_vm7 = vcmask 556032  }
 0x324   :  { %v2683_v44 = vsel %vm5362_vm8, %v2682_v40, %v2380_v32  ;;  %vm5366_vm8 = vcmask 588800   ;;  %v2069_v32 = vsel %vm290_vm0, %v4794_v6, %v2068_v9 }
 0x327   :  { %2515 = vrot.lane.b32.xlu2 %v1955_v33, %s2843_s11  ;;  %v2448_v36 = vpop.permute.xlu1 %2447  ;;  %s2876_s11 = smov [#allocation5]  }
 0x328   :  { %s2742_s12 = sshll.u32 %s2876_s11, 4  ;;  %s2743_s12 = int_to_ptr.vmem [resolvable:$true] %s2742_s12 }
 0x329   :  { %v2384_v34 = vpop.permute.xlu2 %2383 }
 0x32a   :  { %v2684_v13 = vsel %vm2604_vm14, %v2683_v44, %v2384_v34 }
 0x32b   :  { %v2685_v16 = vsel %vm5363_vm15, %v2684_v13, %v2388_v10  ;;  %vm5368_vm15 = vcmask 654336  }
 0x32c   :  { %v2686_v30 = vsel %vm5364_vm9, %v2685_v16, %v2392_v63  ;;  %vm5369_vm9 = vcmask 687104   ;;  %v2464_v63 = vpop.permute.xlu0 %2463 }
 0x32f   :  { %2527 = vrot.lane.b32.xlu2 %v1961_v22, %s2853_s18  ;;  %v2460_v12 = vpop.permute.xlu1 %2459 }
 0x331   :  { %v2396_v49 = vpop.permute.xlu2 %2395 }
 0x332   :  { %v2687_v38 = vsel %vm5365_vm7, %v2686_v30, %v2396_v49  ;;  %vm5370_vm7 = vcmask 719872  }
 0x333   :  { %v2688_v19 = vsel %vm5366_vm8, %v2687_v38, %v2400_v21  ;;  %vm5371_vm8 = vcmask 752640  }
 0x334   :  { %v2689_v53 = vsel %vm5367_vm10, %v2688_v19, %v2404_v24  ;;  %vm5372_vm10 = vcmask 785408   ;;  %v2476_v55 = vpop.permute.xlu0 %2475  ;;  %v1730_v24 = vrot.slane %v4891_v4, 4 }
 0x336   :  { %v1731_v39 = vsel %vm290_vm0, %v1730_v24, %v4884_v3  ;;  %vm5378_vm0 = vcmask 261120  }
 0x337   :  { %2539 = vrot.lane.b32.xlu2 %v1967_v59, %s2872_s8  ;;  %v2472_v26 = vpop.permute.xlu1 %2471 }
 0x339   :  { %v2408_v7 = vpop.permute.xlu2 %2407 }
 0x33a   :  { %v2690_v18 = vsel %vm5368_vm15, %v2689_v53, %v2408_v7  ;;  %vm5373_vm15 = vcmask 818176  }
 0x33b   :  { %v2691_v50 = vsel %vm5369_vm9, %v2690_v18, %v2412_v58  ;;  %vm5374_vm9 = vcmask 850944  }
 0x33c   :  { %v2692_v61 = vsel %vm5370_vm7, %v2691_v50, %v2416_v35  ;;  %vm5375_vm7 = vcmask 883712   ;;  %v2488_v46 = vpop.permute.xlu0 %2487 }
 0x33f   :  { %2551 = vrot.lane.b32.xlu2 %v2069_v32, %s2873_s9  ;;  %v2484_v17 = vpop.permute.xlu1 %2483 }
 0x341   :  { %v2420_v31 = vpop.permute.xlu2 %2419 }
 0x342   :  { %v2693_v10 = vsel %vm5371_vm8, %v2692_v61, %v2420_v31  ;;  %vm5376_vm8 = vcmask 916480  }
 0x343   :  { %v2694_v52 = vsel %vm5372_vm10, %v2693_v10, %v2424_v5  ;;  %vm5377_vm10 = vcmask 228352  }
 0x344   :  { %v2695_v45 = vsel %vm5373_vm15, %v2694_v52, %v2428_v11  ;;  %v2500_v35 = vpop.permute.xlu0 %2499  ;;  %vm5385_vm15 = vcmask 523264  }
 0x347   :  { %2563 = vrot.lane.b32.xlu2 %v2075_v47, %s2874_s10  ;;  %v2496_v62 = vpop.permute.xlu1 %2495 }
 0x349   :  { %v2432_v6 = vpop.permute.xlu2 %2431 }
 0x34a   :  { %v2696_v48 = vsel %vm5374_vm9, %v2695_v45, %v2432_v6  ;;  %vm5386_vm9 = vcmask 556032  }
 0x34b   :  { %v2697_v54 = vsel %vm5375_vm7, %v2696_v48, %v2436_v15  ;;  %vm5387_vm7 = vcmask 588800  }
 0x34c   :  { %v2698_v25 = vsel %vm5376_vm8, %v2697_v54, %v2440_v37  ;;  %v2512_v40 = vpop.permute.xlu0 %2511  ;;  %vm5388_vm8 = vcmask 621568  }
 0x34f   :  { %2575 = vrot.lane.b32.xlu2 %v2081_v20, %s2875_s29  ;;  %v2508_v34 = vpop.permute.xlu1 %2507 }
 0x351   :  { %v2444_v0 = vpop.permute.xlu2 %2443 }
 0x352   :  { %v2699_v51 = vsel %vm2634_vm13, %v2698_v25, %v2444_v0 }
 0x353   :  { %v2700_v21 = vsel %vm2636_vm12, %v2699_v51, %v2448_v36 }
 0x354   :  { %v2701_v14 = vsel %vm2638_vm11, %v2700_v21, %v2452_v41  ;;  %v2524_v49 = vpop.permute.xlu0 %2523 }
 0x355   :  { %2735 = vst [vmem:[#allocation5 + $0x10] sm:$0xff] %v2701_v14 }
 0x357   :  { %v2520_v13 = vpop.permute.xlu1 %2519 }
 0x359   :  { %v2456_v42 = vpop.permute.xlu2 %2455 }
 0x35a   :  { %v2702_v28 = vsel %vm2578_vm1, %v1731_v39, %v2456_v42  ;;  %vm5379_vm1 = vcmask 293888  }
 0x35b   :  { %v2703_v57 = vsel %vm2580_vm2, %v2702_v28, %v2460_v12  ;;  %vm5380_vm2 = vcmask 326656  }
 0x35c   :  { %v2704_v58 = vsel %vm2582_vm3, %v2703_v57, %v2464_v63  ;;  %vm5381_vm3 = vcmask 359424   ;;  %v2536_v7 = vpop.permute.xlu0 %2535 }
 0x35f   :  { %v2532_v59 = vpop.permute.xlu1 %2531 }
 0x361   :  { %v2468_v1 = vpop.permute.xlu2 %2467 }
 0x362   :  { %v2705_v27 = vsel %vm2584_vm4, %v2704_v58, %v2468_v1  ;;  %vm5382_vm4 = vcmask 392192  }
 0x363   :  { %v2706_v33 = vsel %vm2586_vm5, %v2705_v27, %v2472_v26  ;;  %vm5383_vm5 = vcmask 424960  }
 0x364   :  { %v2707_v4 = vsel %vm2588_vm6, %v2706_v33, %v2476_v55  ;;  %vm5384_vm6 = vcmask 490496   ;;  %v2548_v36 = vpop.permute.xlu0 %2547 }
 0x367   :  { %v2544_v18 = vpop.permute.xlu1 %2543 }
 0x369   :  { %v2480_v43 = vpop.permute.xlu2 %2479 }
 0x36a   :  { %v2708_v60 = vsel %vm5377_vm10, %v2707_v4, %v2480_v43  ;;  %vm5389_vm10 = vcmask 654336  }
 0x36b   :  { %v2709_v3 = vsel %vm5378_vm0, %v2708_v60, %v2484_v17  ;;  %vm5390_vm0 = vcmask 687104  }
 0x36c   :  { %v2710_v2 = vsel %vm5379_vm1, %v2709_v3, %v2488_v46  ;;  %vm5392_vm1 = vcmask 752640   ;;  %v2560_v6 = vpop.permute.xlu0 %2559 }
 0x36f   :  { %v2556_v10 = vpop.permute.xlu1 %2555 }
 0x371   :  { %v2492_v23 = vpop.permute.xlu2 %2491 }
 0x372   :  { %v2711_v5 = vsel %vm5380_vm2, %v2710_v2, %v2492_v23  ;;  %vm5393_vm2 = vcmask 785408  }
 0x373   :  { %v2712_v22 = vsel %vm5381_vm3, %v2711_v5, %v2496_v62  ;;  %vm5394_vm3 = vcmask 818176  }
 0x374   :  { %v2713_v11 = vsel %vm5382_vm4, %v2712_v22, %v2500_v35  ;;  %vm5395_vm4 = vcmask 850944   ;;  %v2572_v20 = vpop.permute.xlu0 %2571 }
 0x377   :  { %v2568_v63 = vpop.permute.xlu1 %2567 }
 0x379   :  { %v2504_v44 = vpop.permute.xlu2 %2503 }
 0x37a   :  { %v2714_v16 = vsel %vm5383_vm5, %v2713_v11, %v2504_v44  ;;  %vm5396_vm5 = vcmask 883712  }
 0x37b   :  { %v2715_v30 = vsel %vm2604_vm14, %v2714_v16, %v2508_v34  ;;  %vm5391_vm14 = vcmask 719872  }
 0x37c   :  { %v2716_v38 = vsel %vm5384_vm6, %v2715_v30, %v2512_v40  ;;  %vm5397_vm6 = vcmask 916480  }
 0x381   :  { %v2516_v29 = vpop.permute.xlu2 %2515 }
 0x382   :  { %v2717_v15 = vsel %vm5385_vm15, %v2716_v38, %v2516_v29 }
 0x383   :  { %v2718_v37 = vsel %vm5386_vm9, %v2717_v15, %v2520_v13 }
 0x384   :  { %v2719_v53 = vsel %vm5387_vm7, %v2718_v37, %v2524_v49 }
 0x389   :  { %v2528_v19 = vpop.permute.xlu2 %2527 }
 0x38a   :  { %v2720_v9 = vsel %vm5388_vm8, %v2719_v53, %v2528_v19 }
 0x38b   :  { %v2721_v32 = vsel %vm5389_vm10, %v2720_v9, %v2532_v59 }
 0x38c   :  { %v2722_v31 = vsel %vm5390_vm0, %v2721_v32, %v2536_v7 }
 0x391   :  { %v2540_v50 = vpop.permute.xlu2 %2539 }
 0x392   :  { %v2723_v8 = vsel %vm5391_vm14, %v2722_v31, %v2540_v50 }
 0x393   :  { %v2724_v61 = vsel %vm5392_vm1, %v2723_v8, %v2544_v18 }
 0x394   :  { %v2725_v47 = vsel %vm5393_vm2, %v2724_v61, %v2548_v36 }
 0x399   :  { %v2552_v41 = vpop.permute.xlu2 %2551 }
 0x39a   :  { %v2726_v52 = vsel %vm5394_vm3, %v2725_v47, %v2552_v41 }
 0x39b   :  { %v2727_v45 = vsel %vm5395_vm4, %v2726_v52, %v2556_v10 }
 0x39c   :  { %v2728_v48 = vsel %vm5396_vm5, %v2727_v45, %v2560_v6 }
 0x3a1   :  { %v2564_v12 = vpop.permute.xlu2 %2563 }
 0x3a2   :  { %v2729_v56 = vsel %vm5397_vm6, %v2728_v48, %v2564_v12 }
 0x3a3   :  { %v2730_v54 = vsel %vm2634_vm13, %v2729_v56, %v2568_v63 }
 0x3a4   :  { %v2731_v25 = vsel %vm2636_vm12, %v2730_v54, %v2572_v20 }
 0x3a9   :  { %v2576_v0 = vpop.permute.xlu2 %2575 }
 0x3aa   :  { %v2732_v51 = vsel %vm2638_vm11, %v2731_v25, %v2576_v0 }
 0x3ab   :  { %2736 = vst [vmem:[#allocation5 + $0x18] sm:$0xff] %v2732_v51 }
 0x3ac   :  { %2747 = dma.vmem_to_hbm [thread:$0]  %s2743_s12, 512, %s2745_s15, [#allocation4]  }
 0x3ad   :  { %2840 = dma.done.wait [#allocation4], 512  }
 0x3ae   :  { %2841 = vsyncadd [#allocation4], 4294966784 }
 0x3af   :  { %2752 = vsyncpa [#allocation3], 1 }
 0x3b0   :  { %2753 = vsyncpa [#allocation4], 1 }

// kernel: tpu_custom_call.1
= control target key start
LH: loop header
LB: loop body
LE: loop exit
PB: predicated region body
PF: predicated region fallthrough
CT: control target
= control target key end

     0   :  { %6 = vsyncpa [#allocation3], 0  ;;  %s267_s9 = smov [#allocation2]   ;;  %s268_s11 = smov 128   ;;  %s539_s0 = inlined_call_operand.hbm [shape: f32[2,4,256], index: 0, kind: input, shape index: {}]   ;;  %s540_s1 = inlined_call_operand.vmem [shape: f32[2,256,4], index: 1, kind: output, shape index: {}]  }
   0x1   :  { %s11_s8 = sshll.u32 %s539_s0, 4  ;;  %s13_s10 = sshll.u32 %s267_s9, 4  ;;  %s12_s8 = int_to_ptr.hbm [resolvable:$true] %s11_s8  ;;  %s14_s10 = int_to_ptr.vmem [resolvable:$true] %s13_s10 }
   0x2   :  { %s269_s12 = smov 8  }
   0x3   :  { %19 = dma.hbm_to_vmem [thread:$0]  %s12_s8, 256, %s14_s10, [#allocation3], %s268_s11, %s268_s11, %s269_s12  }
   0x4   :  { %265 = dma.done.wait [#allocation3], 256  }
   0x5   :  { %266 = vsyncadd [#allocation3], 4294967040  ;;  %v25_v0 = vld [vmem:[#allocation2 + $0x8] sm:$0xff]  ;;  %v24_v1 = vld [vmem:[#allocation2] sm:$0xff]  ;;  %vm167_vm0 = vcmask 31744  }
   0x6   :  { %32 = vst [vmem:[#allocation1 + $0x10] ss:$2 sm:$0xff] %v25_v0 }
   0x7   :  { %28 = vst [vmem:[#allocation1] ss:$2 sm:$0xff] %v24_v1 }
   0xd   :  { %v33_v2 = vld.sshfl [vmem:[#allocation1 + $0x10] sm:$0xff pattern:$0x75316420]  ;;  %v34_v4 = vld.sshfl [vmem:[#allocation1 + $0x18] sm:$0xff pattern:$0x75316420] }
   0xe   :  { %103 = vxpose.xlu1.b32.start.end [1/1] (short) %v33_v2, 128  ;;  %v29_v3 = vld.sshfl [vmem:[#allocation1] sm:$0xff pattern:$0x75316420]  ;;  %v30_v5 = vld.sshfl [vmem:[#allocation1 + $0x8] sm:$0xff pattern:$0x75316420] }
   0xf   :  { %39 = vxpose.xlu0.b32.start.end [1/1] (short) %v29_v3, 128 }
  0x8e   :  { %135 = vxpose.xlu1.b32.start.end [1/1] (short) %v34_v4, 128 }
  0x8f   :  { %71 = vxpose.xlu0.b32.start.end [1/1] (short) %v30_v5, 128 }
  0xb2   :  { %v119_v6 = vpop.trf.xlu1 }
  0xb3   :  { %200 = vst.msk [vmem:[%s540_s1 + $0x100] sm:$0xff] %vm167_vm0, %v119_v6  ;;  %v55_v7 = vpop.trf.xlu0 }
  0xb4   :  { %168 = vst.msk [vmem:[%s540_s1] sm:$0xff] %vm167_vm0, %v55_v7 }
  0xba   :  { %v120_v8 = vpop.trf.xlu1 }
  0xbb   :  { %201 = vst.msk [vmem:[%s540_s1 + $0x108] sm:$0xff] %vm167_vm0, %v120_v8  ;;  %v56_v9 = vpop.trf.xlu0 }
  0xbc   :  { %169 = vst.msk [vmem:[%s540_s1 + $0x8] sm:$0xff] %vm167_vm0, %v56_v9 }
  0xc2   :  { %v121_v10 = vpop.trf.xlu1 }
  0xc3   :  { %202 = vst.msk [vmem:[%s540_s1 + $0x110] sm:$0xff] %vm167_vm0, %v121_v10  ;;  %v57_v11 = vpop.trf.xlu0 }
  0xc4   :  { %170 = vst.msk [vmem:[%s540_s1 + $0x10] sm:$0xff] %vm167_vm0, %v57_v11 }
  0xca   :  { %v122_v12 = vpop.trf.xlu1 }
  0xcb   :  { %203 = vst.msk [vmem:[%s540_s1 + $0x118] sm:$0xff] %vm167_vm0, %v122_v12  ;;  %v58_v13 = vpop.trf.xlu0 }
  0xcc   :  { %171 = vst.msk [vmem:[%s540_s1 + $0x18] sm:$0xff] %vm167_vm0, %v58_v13 }
  0xd2   :  { %v123_v14 = vpop.trf.xlu1 }
  0xd3   :  { %204 = vst.msk [vmem:[%s540_s1 + $0x120] sm:$0xff] %vm167_vm0, %v123_v14  ;;  %v59_v15 = vpop.trf.xlu0 }
  0xd4   :  { %172 = vst.msk [vmem:[%s540_s1 + $0x20] sm:$0xff] %vm167_vm0, %v59_v15 }
  0xda   :  { %v124_v16 = vpop.trf.xlu1 }
  0xdb   :  { %205 = vst.msk [vmem:[%s540_s1 + $0x128] sm:$0xff] %vm167_vm0, %v124_v16  ;;  %v60_v17 = vpop.trf.xlu0 }
  0xdc   :  { %173 = vst.msk [vmem:[%s540_s1 + $0x28] sm:$0xff] %vm167_vm0, %v60_v17 }
  0xe2   :  { %v125_v18 = vpop.trf.xlu1 }
  0xe3   :  { %206 = vst.msk [vmem:[%s540_s1 + $0x130] sm:$0xff] %vm167_vm0, %v125_v18  ;;  %v61_v19 = vpop.trf.xlu0 }
  0xe4   :  { %174 = vst.msk [vmem:[%s540_s1 + $0x30] sm:$0xff] %vm167_vm0, %v61_v19 }
  0xea   :  { %v126_v20 = vpop.trf.xlu1 }
  0xeb   :  { %207 = vst.msk [vmem:[%s540_s1 + $0x138] sm:$0xff] %vm167_vm0, %v126_v20  ;;  %v62_v21 = vpop.trf.xlu0 }
  0xec   :  { %175 = vst.msk [vmem:[%s540_s1 + $0x38] sm:$0xff] %vm167_vm0, %v62_v21 }
  0xf2   :  { %v127_v22 = vpop.trf.xlu1 }
  0xf3   :  { %208 = vst.msk [vmem:[%s540_s1 + $0x140] sm:$0xff] %vm167_vm0, %v127_v22  ;;  %v63_v23 = vpop.trf.xlu0 }
  0xf4   :  { %176 = vst.msk [vmem:[%s540_s1 + $0x40] sm:$0xff] %vm167_vm0, %v63_v23 }
  0xfa   :  { %v128_v24 = vpop.trf.xlu1 }
  0xfb   :  { %209 = vst.msk [vmem:[%s540_s1 + $0x148] sm:$0xff] %vm167_vm0, %v128_v24  ;;  %v64_v25 = vpop.trf.xlu0 }
  0xfc   :  { %177 = vst.msk [vmem:[%s540_s1 + $0x48] sm:$0xff] %vm167_vm0, %v64_v25 }
 0x102   :  { %v129_v26 = vpop.trf.xlu1 }
 0x103   :  { %210 = vst.msk [vmem:[%s540_s1 + $0x150] sm:$0xff] %vm167_vm0, %v129_v26  ;;  %v65_v27 = vpop.trf.xlu0 }
 0x104   :  { %178 = vst.msk [vmem:[%s540_s1 + $0x50] sm:$0xff] %vm167_vm0, %v65_v27 }
 0x10a   :  { %v130_v28 = vpop.trf.xlu1 }
 0x10b   :  { %211 = vst.msk [vmem:[%s540_s1 + $0x158] sm:$0xff] %vm167_vm0, %v130_v28  ;;  %v66_v29 = vpop.trf.xlu0 }
 0x10c   :  { %179 = vst.msk [vmem:[%s540_s1 + $0x58] sm:$0xff] %vm167_vm0, %v66_v29 }
 0x112   :  { %v131_v30 = vpop.trf.xlu1 }
 0x113   :  { %212 = vst.msk [vmem:[%s540_s1 + $0x160] sm:$0xff] %vm167_vm0, %v131_v30  ;;  %v67_v31 = vpop.trf.xlu0 }
 0x114   :  { %180 = vst.msk [vmem:[%s540_s1 + $0x60] sm:$0xff] %vm167_vm0, %v67_v31 }
 0x11a   :  { %v132_v32 = vpop.trf.xlu1 }
 0x11b   :  { %213 = vst.msk [vmem:[%s540_s1 + $0x168] sm:$0xff] %vm167_vm0, %v132_v32  ;;  %v68_v33 = vpop.trf.xlu0 }
 0x11c   :  { %181 = vst.msk [vmem:[%s540_s1 + $0x68] sm:$0xff] %vm167_vm0, %v68_v33 }
 0x122   :  { %v133_v34 = vpop.trf.xlu1 }
 0x123   :  { %214 = vst.msk [vmem:[%s540_s1 + $0x170] sm:$0xff] %vm167_vm0, %v133_v34  ;;  %v69_v35 = vpop.trf.xlu0 }
 0x124   :  { %182 = vst.msk [vmem:[%s540_s1 + $0x70] sm:$0xff] %vm167_vm0, %v69_v35 }
 0x12a   :  { %v134_v36 = vpop.trf.xlu1 }
 0x12b   :  { %215 = vst.msk [vmem:[%s540_s1 + $0x178] sm:$0xff] %vm167_vm0, %v134_v36  ;;  %v70_v37 = vpop.trf.xlu0 }
 0x12c   :  { %183 = vst.msk [vmem:[%s540_s1 + $0x78] sm:$0xff] %vm167_vm0, %v70_v37 }
 0x132   :  { %v151_v38 = vpop.trf.xlu1 }
 0x133   :  { %216 = vst.msk [vmem:[%s540_s1 + $0x180] sm:$0xff] %vm167_vm0, %v151_v38  ;;  %v87_v39 = vpop.trf.xlu0 }
 0x134   :  { %184 = vst.msk [vmem:[%s540_s1 + $0x80] sm:$0xff] %vm167_vm0, %v87_v39 }
 0x13a   :  { %v152_v40 = vpop.trf.xlu1 }
 0x13b   :  { %217 = vst.msk [vmem:[%s540_s1 + $0x188] sm:$0xff] %vm167_vm0, %v152_v40  ;;  %v88_v41 = vpop.trf.xlu0 }
 0x13c   :  { %185 = vst.msk [vmem:[%s540_s1 + $0x88] sm:$0xff] %vm167_vm0, %v88_v41 }
 0x142   :  { %v153_v42 = vpop.trf.xlu1 }
 0x143   :  { %218 = vst.msk [vmem:[%s540_s1 + $0x190] sm:$0xff] %vm167_vm0, %v153_v42  ;;  %v89_v43 = vpop.trf.xlu0 }
 0x144   :  { %186 = vst.msk [vmem:[%s540_s1 + $0x90] sm:$0xff] %vm167_vm0, %v89_v43 }
 0x14a   :  { %v154_v44 = vpop.trf.xlu1 }
 0x14b   :  { %219 = vst.msk [vmem:[%s540_s1 + $0x198] sm:$0xff] %vm167_vm0, %v154_v44  ;;  %v90_v45 = vpop.trf.xlu0 }
 0x14c   :  { %187 = vst.msk [vmem:[%s540_s1 + $0x98] sm:$0xff] %vm167_vm0, %v90_v45 }
 0x152   :  { %v155_v46 = vpop.trf.xlu1 }
 0x153   :  { %220 = vst.msk [vmem:[%s540_s1 + $0x1a0] sm:$0xff] %vm167_vm0, %v155_v46  ;;  %v91_v47 = vpop.trf.xlu0 }
 0x154   :  { %188 = vst.msk [vmem:[%s540_s1 + $0xa0] sm:$0xff] %vm167_vm0, %v91_v47 }
 0x15a   :  { %v156_v48 = vpop.trf.xlu1 }
 0x15b   :  { %221 = vst.msk [vmem:[%s540_s1 + $0x1a8] sm:$0xff] %vm167_vm0, %v156_v48  ;;  %v92_v49 = vpop.trf.xlu0 }
 0x15c   :  { %189 = vst.msk [vmem:[%s540_s1 + $0xa8] sm:$0xff] %vm167_vm0, %v92_v49 }
 0x162   :  { %v157_v50 = vpop.trf.xlu1 }
 0x163   :  { %222 = vst.msk [vmem:[%s540_s1 + $0x1b0] sm:$0xff] %vm167_vm0, %v157_v50  ;;  %v93_v51 = vpop.trf.xlu0 }
 0x164   :  { %190 = vst.msk [vmem:[%s540_s1 + $0xb0] sm:$0xff] %vm167_vm0, %v93_v51 }
 0x16a   :  { %v158_v52 = vpop.trf.xlu1 }
 0x16b   :  { %223 = vst.msk [vmem:[%s540_s1 + $0x1b8] sm:$0xff] %vm167_vm0, %v158_v52  ;;  %v94_v53 = vpop.trf.xlu0 }
 0x16c   :  { %191 = vst.msk [vmem:[%s540_s1 + $0xb8] sm:$0xff] %vm167_vm0, %v94_v53 }
 0x172   :  { %v159_v54 = vpop.trf.xlu1 }
 0x173   :  { %224 = vst.msk [vmem:[%s540_s1 + $0x1c0] sm:$0xff] %vm167_vm0, %v159_v54  ;;  %v95_v55 = vpop.trf.xlu0 }
 0x174   :  { %192 = vst.msk [vmem:[%s540_s1 + $0xc0] sm:$0xff] %vm167_vm0, %v95_v55 }
 0x17a   :  { %v160_v56 = vpop.trf.xlu1 }
 0x17b   :  { %225 = vst.msk [vmem:[%s540_s1 + $0x1c8] sm:$0xff] %vm167_vm0, %v160_v56  ;;  %v96_v57 = vpop.trf.xlu0 }
 0x17c   :  { %193 = vst.msk [vmem:[%s540_s1 + $0xc8] sm:$0xff] %vm167_vm0, %v96_v57 }
 0x182   :  { %v161_v58 = vpop.trf.xlu1 }
 0x183   :  { %226 = vst.msk [vmem:[%s540_s1 + $0x1d0] sm:$0xff] %vm167_vm0, %v161_v58  ;;  %v97_v59 = vpop.trf.xlu0 }
 0x184   :  { %194 = vst.msk [vmem:[%s540_s1 + $0xd0] sm:$0xff] %vm167_vm0, %v97_v59 }
 0x18a   :  { %v162_v60 = vpop.trf.xlu1 }
 0x18b   :  { %227 = vst.msk [vmem:[%s540_s1 + $0x1d8] sm:$0xff] %vm167_vm0, %v162_v60  ;;  %v98_v61 = vpop.trf.xlu0 }
 0x18c   :  { %195 = vst.msk [vmem:[%s540_s1 + $0xd8] sm:$0xff] %vm167_vm0, %v98_v61 }
 0x192   :  { %v163_v62 = vpop.trf.xlu1 }
 0x193   :  { %228 = vst.msk [vmem:[%s540_s1 + $0x1e0] sm:$0xff] %vm167_vm0, %v163_v62  ;;  %v99_v63 = vpop.trf.xlu0 }
 0x194   :  { %196 = vst.msk [vmem:[%s540_s1 + $0xe0] sm:$0xff] %vm167_vm0, %v99_v63 }
 0x19a   :  { %v164_v0 = vpop.trf.xlu1 }
 0x19b   :  { %229 = vst.msk [vmem:[%s540_s1 + $0x1e8] sm:$0xff] %vm167_vm0, %v164_v0  ;;  %v100_v1 = vpop.trf.xlu0 }
 0x19c   :  { %197 = vst.msk [vmem:[%s540_s1 + $0xe8] sm:$0xff] %vm167_vm0, %v100_v1 }
 0x1a2   :  { %v165_v2 = vpop.trf.xlu1 }
 0x1a3   :  { %230 = vst.msk [vmem:[%s540_s1 + $0x1f0] sm:$0xff] %vm167_vm0, %v165_v2  ;;  %v101_v3 = vpop.trf.xlu0 }
 0x1a4   :  { %198 = vst.msk [vmem:[%s540_s1 + $0xf0] sm:$0xff] %vm167_vm0, %v101_v3 }
 0x1aa   :  { %v166_v4 = vpop.trf.xlu1 }
 0x1ab   :  { %231 = vst.msk [vmem:[%s540_s1 + $0x1f8] sm:$0xff] %vm167_vm0, %v166_v4  ;;  %v102_v5 = vpop.trf.xlu0 }
 0x1ac   :  { %199 = vst.msk [vmem:[%s540_s1 + $0xf8] sm:$0xff] %vm167_vm0, %v102_v5 }
 0x1ad   :  { %236 = vsyncpa [#allocation3], 1 }

</bundles_post_ra>
